<compile_context>
chip_gen: v5e
topology: v5e:2x2
jax: 0.10.0
libtpu: 0.0.40
codegen_flags: <defaults>
</compile_context>

<pallas_src>
import jax
import jax.numpy as jnp
from jax.experimental import pallas as pl
from jax.experimental.pallas import tpu as pltpu


def _round_up(x, m):
    return ((x + m - 1) // m) * m


def _im2col_npk(x, kh, kw, stride):
    """x: (N, C, H, W) -> patches (N, OH*OW, C*kh*kw) with K ordered (c, kh, kw).

    Built directly in (N, P, K) layout so no transpose of the kh*kw-times-larger
    im2col buffer is needed (only a single NCHW->NHWC pass over x).
    """
    N, C, H, W = x.shape
    oh = (H - kh) // stride + 1
    ow = (W - kw) // stride + 1
    x_nhwc = jnp.transpose(x, (0, 2, 3, 1))                      # (N, H, W, C)
    cols = []
    for i in range(kh):
        for j in range(kw):
            cols.append(x_nhwc[:, i:i + stride * oh:stride,
                                  j:j + stride * ow:stride, :])   # (N, OH, OW, C)
    p = jnp.stack(cols, axis=-1)                                  # (N, OH, OW, C, kh*kw)
    # Flatten: k = c*(kh*kw) + (i*kw + j)  -- matches weight.reshape(n_class, K).
    return p.reshape(N, oh * ow, C * kh * kw), oh, ow
# TODO(synk): for very small C*kh*kw the materialized im2col still amplifies HBM
# reads by kh*kw; a fully fused window-load kernel (memory_space=pl.ANY + manual
# DMA) would remove that but is not needed at these shapes.


def ratio_zero_padding_forward(x, weight, bias, stride=1):
    """x: (N, C, H, W) f32; weight: (n_class, C, kh, kw); bias: (n_class,).

    Returns (N, n_class) f32 == Flatten(GAP(ReLU(Conv2d_valid(x)))).
    """
    n_class, c_in, kh, kw = weight.shape
    patches, _, _ = _im2col_npk(x, kh, kw, stride)                # (N, P, K) f32
    N, P, K = patches.shape

    COUT = _round_up(n_class, 128)      # lane-dense output (>=128 lanes)
    TB = 8                              # batch rows per grid step (sublane-aligned)
    # Keep the double-buffered bf16 patches block comfortably small (v7x: 64 MiB
    # physical / 32 MiB scoped VMEM). Budget ~4 MiB for the pair of buffers.
    max_tp = max(16, (4 * 1024 * 1024) // (2 * TB * K * 2))
    max_tp = (max_tp // 16) * 16        # multiple of 16: clean bf16 sublane packing
    TP = min(_round_up(P, 16), max(16, max_tp), 512)
    P_PAD = _round_up(P, TP)
    N_PAD = _round_up(N, TB)

    patches = jnp.pad(patches, ((0, N_PAD - N), (0, P_PAD - P), (0, 0)))
    patches = patches.astype(jnp.bfloat16)                        # bf16 MXU operands
    w_mat = weight.reshape(n_class, K).T                           # (K, n_class)
    w_mat = jnp.pad(w_mat, ((0, 0), (0, COUT - n_class))).astype(jnp.bfloat16)
    b_mat = jnp.pad(bias.reshape(1, n_class).astype(jnp.float32),
                    ((0, 0), (0, COUT - n_class)))                 # f32 bias

    inv_p = 1.0 / float(P)                                         # static constant
    grid = (N_PAD // TB, P_PAD // TP)

    def kernel(p_ref, w_ref, b_ref, o_ref, acc_ref):
        pk = pl.program_id(1)

        @pl.when(pk == 0)
        def _init():
            acc_ref[...] = jnp.zeros_like(acc_ref)

        # One large MXU matmul per step: (TB*TP, K) x (K, COUT) -> f32.
        lhs = p_ref[...].reshape(TB * TP, K)                       # bf16
        s = jnp.dot(lhs, w_ref[...], preferred_element_type=jnp.float32)
        s = jnp.maximum(s + b_ref[...], 0.0)                       # bias + ReLU (f32)
        s = s.reshape(TB, TP, COUT)
        if P_PAD > P:   # static: zero out spatial positions that are pure padding
            row = jax.lax.broadcasted_iota(jnp.int32, (TP, COUT), 0) + pk * TP
            s = jnp.where(row < P, s, 0.0)
        acc_ref[...] += jnp.sum(s, axis=1)                         # partial GAP sums

        @pl.when(pk == pl.num_programs(1) - 1)
        def _finalize():
            o_ref[...] = acc_ref[...] * inv_p                      # lane-dense store

    out = pl.pallas_call(
        kernel,
        out_shape=jax.ShapeDtypeStruct((N_PAD, COUT), jnp.float32),
        grid_spec=pltpu.PrefetchScalarGridSpec(
            num_scalar_prefetch=0,
            grid=grid,
            in_specs=[
                pl.BlockSpec((TB, TP, K), lambda b, p: (b, p, 0)),
                # weight/bias blocks are constant across the grid; they are tiny
                # here so the default double-buffer costs nothing.
                pl.BlockSpec((K, COUT), lambda b, p: (0, 0)),
                pl.BlockSpec((1, COUT), lambda b, p: (0, 0)),
            ],
            out_specs=pl.BlockSpec((TB, COUT), lambda b, p: (b, 0)),
            scratch_shapes=[pltpu.VMEM((TB, COUT), jnp.float32)],
        ),
        compiler_params=pltpu.CompilerParams(
            dimension_semantics=("parallel", "arbitrary"),
            vmem_limit_bytes=32 * 1024 * 1024,
        ),
    )(patches, w_mat, b_mat)

    return out[:N, :n_class]                                       # Flatten


if __name__ == "__main__":
    batch, in_channels, spatial = 2, 4, 16
    f_size, n_class, stride = 3, 8, 1

    key = jax.random.PRNGKey(0)
    kx, kw_, kb = jax.random.split(key, 3)

    x = jax.random.normal(kx, (batch, in_channels, spatial, spatial),
                          dtype=jnp.float32)

    # Kaiming-normal (fan_in, relu) conv weight; small nonzero bias so the
    # padded-position masking path is actually exercised.
    fan_in = in_channels * f_size * f_size
    std = (2.0 / fan_in) ** 0.5
    weight = std * jax.random.normal(
        kw_, (n_class, in_channels, f_size, f_size), dtype=jnp.float32)
    bias = 0.1 * jax.random.normal(kb, (n_class,), dtype=jnp.float32)

    out = ratio_zero_padding_forward(x, weight, bias, stride=stride)
    out = jax.block_until_ready(out)

    # Reference: plain-JAX conv -> bias -> relu -> GAP -> flatten (f32).
    ref = jax.lax.conv_general_dilated(
        x, weight, window_strides=(stride, stride), padding="VALID",
        dimension_numbers=("NCHW", "OIHW", "NCHW"),
        precision=jax.lax.Precision.HIGHEST)
    ref = jnp.maximum(ref + bias[None, :, None, None], 0.0)
    ref = jnp.mean(ref, axis=(2, 3))

    assert out.shape == (batch, n_class)
    assert jnp.allclose(out, ref, atol=1e-2, rtol=1e-2), (
        f"max abs err {jnp.max(jnp.abs(out - ref))}")

    print("KERNEL_OK")
</pallas_src>

<mosaic_0001>
module attributes {stable_mosaic.version = 11 : i64} {
  func.func @kernel(%arg0: i32, %arg1: i32, %arg2: memref<8x208x36xbf16, #tpu.memory_space<vmem>>, %arg3: memref<36x128xbf16, #tpu.memory_space<vmem>>, %arg4: memref<1x128xf32, #tpu.memory_space<vmem>>, %arg5: memref<8x128xf32, #tpu.memory_space<vmem>>, %arg6: memref<8x128xf32, #tpu.memory_space<vmem>>) attributes {dimension_semantics = [#tpu.dimension_semantics<parallel>, #tpu.dimension_semantics<arbitrary>], iteration_bounds = array<i64: 1, 1>, scalar_prefetch = 0 : i64, scratch_operands = 1 : i64, tpu.core_type = #tpu.core_type<tc>, window_params = [{transform_indices = @transform_0, window_bounds = array<i64: 8, 208, 36>}, {pipeline_mode = #tpu.pipeline_mode<synchronous>, transform_indices = @transform_1, window_bounds = array<i64: 36, 128>}, {pipeline_mode = #tpu.pipeline_mode<synchronous>, transform_indices = @transform_2, window_bounds = array<i64: 1, 128>}, {transform_indices = @transform_3, window_bounds = array<i64: 8, 128>}]} {
    %c0_i32 = arith.constant 0 : i32
    %0 = arith.cmpi eq, %arg1, %c0_i32 : i32
    %1 = arith.extui %0 : i1 to i32
    %c0_i32_0 = arith.constant 0 : i32
    %2 = arith.cmpi ne, %1, %c0_i32_0 : i32
    scf.if %2 {
      %cst_16 = arith.constant 0.000000e+00 : f32
      %30 = vector.broadcast %cst_16 : f32 to vector<8x128xf32>
      %c0_17 = arith.constant 0 : index
      %c0_18 = arith.constant 0 : index
      %31 = vector.load %arg6[%c0_17, %c0_18] : memref<8x128xf32, #tpu.memory_space<vmem>>, vector<8x128xf32>
      tpu.vector_store %arg6[%c0_17, %c0_18], %30 {strides = array<i32>} : memref<8x128xf32, #tpu.memory_space<vmem>>, vector<8x128xf32>,
    } else {
    }
    %c0 = arith.constant 0 : index
    %c0_1 = arith.constant 0 : index
    %c0_2 = arith.constant 0 : index
    %3 = vector.load %arg2[%c0, %c0_1, %c0_2] : memref<8x208x36xbf16, #tpu.memory_space<vmem>>, vector<8x208x36xbf16>
    %4 = vector.shape_cast %3 : vector<8x208x36xbf16> to vector<1664x36xbf16>
    %c0_3 = arith.constant 0 : index
    %c0_4 = arith.constant 0 : index
    %5 = vector.load %arg3[%c0_3, %c0_4] : memref<36x128xbf16, #tpu.memory_space<vmem>>, vector<36x128xbf16>
    %cst = arith.constant dense<0.000000e+00> : vector<1664x128xf32>
    %6 = tpu.matmul %4, %5, %cst {dimension_numbers = #tpu.dot_dimension_numbers<[1], [0], [0], [1], [0, 0, 1, 1], [], []>} : vector<1664x36xbf16>, vector<36x128xbf16>, vector<1664x128xf32> -> vector<1664x128xf32>
    %c0_5 = arith.constant 0 : index
    %c0_6 = arith.constant 0 : index
    %7 = vector.load %arg4[%c0_5, %c0_6] : memref<1x128xf32, #tpu.memory_space<vmem>>, vector<1x128xf32>
    %8 = vector.broadcast %7 : vector<1x128xf32> to vector<1664x128xf32>
    %9 = arith.addf %6, %8 : vector<1664x128xf32>
    %cst_7 = arith.constant 0.000000e+00 : f32
    %10 = vector.broadcast %cst_7 : f32 to vector<1664x128xf32>
    %11 = arith.maximumf %9, %10 : vector<1664x128xf32>
    %12 = vector.shape_cast %11 : vector<1664x128xf32> to vector<8x208x128xf32>
    %13 = tpu.iota {dimensions = array<i32: 0>} : vector<208x128xi32>
    %c208_i32 = arith.constant 208 : i32
    %14 = arith.muli %arg1, %c208_i32 : i32
    %15 = vector.broadcast %14 : i32 to vector<208x128xi32>
    %16 = arith.addi %13, %15 : vector<208x128xi32>
    %c196_i32 = arith.constant 196 : i32
    %17 = vector.broadcast %c196_i32 : i32 to vector<208x128xi32>
    %18 = arith.cmpi slt, %16, %17 : vector<208x128xi32>
    %cst_8 = arith.constant 0.000000e+00 : f32
    %19 = vector.shape_cast %18 : vector<208x128xi1> to vector<1x208x128xi1>
    %20 = vector.broadcast %19 : vector<1x208x128xi1> to vector<8x208x128xi1>
    %21 = vector.broadcast %cst_8 : f32 to vector<8x208x128xf32>
    %22 = arith.select %20, %12, %21 : vector<8x208x128xi1>, vector<8x208x128xf32>
    %c0_9 = arith.constant 0 : index
    %c0_10 = arith.constant 0 : index
    %23 = vector.load %arg6[%c0_9, %c0_10] : memref<8x128xf32, #tpu.memory_space<vmem>>, vector<8x128xf32>
    %cst_11 = arith.constant dense<0.000000e+00> : vector<8x128xf32>
    %24 = vector.multi_reduction <add>, %22, %cst_11 [1] : vector<8x208x128xf32> to vector<8x128xf32>
    %25 = arith.addf %23, %24 : vector<8x128xf32>
    %c0_12 = arith.constant 0 : index
    %c0_13 = arith.constant 0 : index
    %26 = vector.load %arg6[%c0_12, %c0_13] : memref<8x128xf32, #tpu.memory_space<vmem>>, vector<8x128xf32>
    tpu.vector_store %arg6[%c0_12, %c0_13], %25 {strides = array<i32>} : memref<8x128xf32, #tpu.memory_space<vmem>>, vector<8x128xf32>,
    %c0_i32_14 = arith.constant 0 : i32
    %27 = arith.cmpi eq, %arg1, %c0_i32_14 : i32
    %28 = arith.extui %27 : i1 to i32
    %c0_i32_15 = arith.constant 0 : i32
    %29 = arith.cmpi ne, %28, %c0_i32_15 : i32
    scf.if %29 {
      %c0_16 = arith.constant 0 : index
      %c0_17 = arith.constant 0 : index
      %30 = vector.load %arg6[%c0_16, %c0_17] : memref<8x128xf32, #tpu.memory_space<vmem>>, vector<8x128xf32>
      %cst_18 = arith.constant 0.00510204071 : f32
      %31 = vector.broadcast %cst_18 : f32 to vector<8x128xf32>
      %32 = arith.mulf %30, %31 : vector<8x128xf32>
      %c0_19 = arith.constant 0 : index
      %c0_20 = arith.constant 0 : index
      %33 = vector.load %arg5[%c0_19, %c0_20] : memref<8x128xf32, #tpu.memory_space<vmem>>, vector<8x128xf32>
      tpu.vector_store %arg5[%c0_19, %c0_20], %32 {strides = array<i32>} : memref<8x128xf32, #tpu.memory_space<vmem>>, vector<8x128xf32>,
    } else {
    }
    return
  }
  func.func @transform_0(%arg0: i32, %arg1: i32) -> (i32, i32, i32) {
    %c0_i32 = arith.constant 0 : i32
    %c0_i32_0 = arith.constant 0 : i32
    return %arg0, %arg1, %c0_i32 : i32, i32, i32
  }
  func.func @transform_1(%arg0: i32, %arg1: i32) -> (i32, i32) {
    %c0_i32 = arith.constant 0 : i32
    %c0_i32_0 = arith.constant 0 : i32
    %c0_i32_1 = arith.constant 0 : i32
    return %c0_i32, %c0_i32_0 : i32, i32
  }
  func.func @transform_2(%arg0: i32, %arg1: i32) -> (i32, i32) {
    %c0_i32 = arith.constant 0 : i32
    %c0_i32_0 = arith.constant 0 : i32
    %c0_i32_1 = arith.constant 0 : i32
    return %c0_i32, %c0_i32_0 : i32, i32
  }
  func.func @transform_3(%arg0: i32, %arg1: i32) -> (i32, i32) {
    %c0_i32 = arith.constant 0 : i32
    %c0_i32_0 = arith.constant 0 : i32
    return %arg0, %c0_i32 : i32, i32
  }
}

</mosaic_0001>

<bundles_post_ra>
// kernel: tpu_custom_call.1
= control target key start
LH: loop header
LB: loop body
LE: loop exit
PB: predicated region body
PF: predicated region fallthrough
CT: control target
= control target key end

     0   :  { %vm1086_vm0 = vcmask 1041408   ;;  %s3888_s0 = inlined_call_operand.vmem [shape: bf16[8,208,36], index: 0, kind: input, shape index: {}]   ;;  %s3889_s1 = inlined_call_operand.vmem [shape: bf16[36,128], index: 1, kind: input, shape index: {}]   ;;  %s3890_s2 = inlined_call_operand.vmem [shape: f32[1,128], index: 2, kind: input, shape index: {}]   ;;  %s3891_s3 = inlined_call_operand.hbm [shape: f32[8,128], index: 3, kind: output, shape index: {}]  }
   0x1   :  { %v233_v0 = vld [vmem:[%s3889_s1 + $0x10] sm:$0x3] }
   0x2   :  { %v767_v1 = vunpack.c.l.b16 %v233_v0 }
   0x4   :  { %v770_v2 = vpack.c.b16 %v767_v1, %v767_v1 }
   0x5   :  { %8 = vsyncpa [#allocation4], 0  ;;  %v3097_v4 = vld [vmem:[%s3889_s1 + $0x8] sm:$0xff]  ;;  %v3096_v5 = vld [vmem:[%s3889_s1] sm:$0xff]  ;;  %vm773_vm1 = vcmask 293888   ;;  %vm2425_vm3 = vcmask 1041409  }
   0x6   :  { %v1088_v3 = vsel %vm1086_vm0, %v770_v2, 0  ;;  %v2992_v6 = vld [vmem:[%s3888_s0] sm:$0xff]  ;;  %v3018_v7 = vld [vmem:[%s3888_s0 + $0xd0] sm:$0xff]  ;;  %v2993_v10 = vld [vmem:[%s3888_s0 + $0x8] sm:$0xff]  ;;  %vm2427_vm4 = vcmask 1042434   ;;  %vm2429_vm5 = vcmask 1043459  }
   0x7   :  { %1095 = vmatpush.bf16.msra.mxu0 %v1088_v3  ;;  %3098 = vmatpush.bf16.msra.mxu1 %v1088_v3  ;;  %v3044_v8 = vld [vmem:[%s3888_s0 + $0x1a0] sm:$0xff]  ;;  %v3070_v9 = vld [vmem:[%s3888_s0 + $0x270] sm:$0xff]  ;;  %v3019_v11 = vld [vmem:[%s3888_s0 + $0xd8] sm:$0xff]  ;;  %vm2431_vm6 = vcmask 1044484   ;;  %vm2433_vm7 = vcmask 1045509   ;;  %vm2435_vm8 = vcmask 1046534  }
   0x8   :  { %3099 = vmatpush.bf16.msra.mxu2 %v1088_v3  ;;  %3100 = vmatpush.bf16.msra.mxu3 %v1088_v3  ;;  %v3045_v12 = vld [vmem:[%s3888_s0 + $0x1a8] sm:$0xff]  ;;  %v3071_v13 = vld [vmem:[%s3888_s0 + $0x278] sm:$0xff]  ;;  %v2994_v14 = vld [vmem:[%s3888_s0 + $0x10] sm:$0xff]  ;;  %vm2437_vm9 = vcmask 1047559   ;;  %s2455_s7 = sshll.u32 %s3891_s3, 4  ;;  %s2456_s7 = int_to_ptr.hbm [resolvable:$true] %s2455_s7 }
   0x9   :  { %v3020_v15 = vld [vmem:[%s3888_s0 + $0xe0] sm:$0xff]  ;;  %v3046_v16 = vld [vmem:[%s3888_s0 + $0x1b0] sm:$0xff]  ;;  %v2995_v18 = vld [vmem:[%s3888_s0 + $0x18] sm:$0xff] }
   0xa   :  { %v3072_v17 = vld [vmem:[%s3888_s0 + $0x280] sm:$0xff]  ;;  %v3021_v19 = vld [vmem:[%s3888_s0 + $0xe8] sm:$0xff]  ;;  %v3047_v20 = vld [vmem:[%s3888_s0 + $0x1b8] sm:$0xff] }
   0xb   :  { %1096 = vmatpush.bf16.msra.mxu0 %v3097_v4  ;;  %3101 = vmatpush.bf16.msra.mxu1 %v3097_v4  ;;  %v3073_v21 = vld [vmem:[%s3888_s0 + $0x288] sm:$0xff]  ;;  %v2996_v22 = vld [vmem:[%s3888_s0 + $0x20] sm:$0xff]  ;;  %v3022_v23 = vld [vmem:[%s3888_s0 + $0xf0] sm:$0xff] }
   0xc   :  { %3102 = vmatpush.bf16.msra.mxu2 %v3097_v4  ;;  %3103 = vmatpush.bf16.msra.mxu3 %v3097_v4  ;;  %v3048_v24 = vld [vmem:[%s3888_s0 + $0x1c0] sm:$0xff]  ;;  %v3074_v25 = vld [vmem:[%s3888_s0 + $0x290] sm:$0xff]  ;;  %v2997_v26 = vld [vmem:[%s3888_s0 + $0x28] sm:$0xff] }
   0xd   :  { %v3023_v27 = vld [vmem:[%s3888_s0 + $0xf8] sm:$0xff]  ;;  %v3049_v28 = vld [vmem:[%s3888_s0 + $0x1c8] sm:$0xff]  ;;  %v2998_v30 = vld [vmem:[%s3888_s0 + $0x30] sm:$0xff] }
   0xe   :  { %v3075_v29 = vld [vmem:[%s3888_s0 + $0x298] sm:$0xff]  ;;  %v3024_v31 = vld [vmem:[%s3888_s0 + $0x100] sm:$0xff]  ;;  %v3050_v32 = vld [vmem:[%s3888_s0 + $0x1d0] sm:$0xff] }
   0xf   :  { %1097 = vmatpush.bf16.msra.mxu0 %v3096_v5  ;;  %3104 = vmatpush.bf16.msra.mxu1 %v3096_v5  ;;  %v3076_v33 = vld [vmem:[%s3888_s0 + $0x2a0] sm:$0xff]  ;;  %v2999_v34 = vld [vmem:[%s3888_s0 + $0x38] sm:$0xff]  ;;  %v3025_v35 = vld [vmem:[%s3888_s0 + $0x108] sm:$0xff] }
  0x10   :  { %3105 = vmatpush.bf16.msra.mxu2 %v3096_v5  ;;  %3106 = vmatpush.bf16.msra.mxu3 %v3096_v5  ;;  %v3051_v36 = vld [vmem:[%s3888_s0 + $0x1d8] sm:$0xff]  ;;  %v3077_v37 = vld [vmem:[%s3888_s0 + $0x2a8] sm:$0xff]  ;;  %v3000_v38 = vld [vmem:[%s3888_s0 + $0x40] sm:$0xff] }
  0x11   :  { %v3026_v39 = vld [vmem:[%s3888_s0 + $0x110] sm:$0xff]  ;;  %v3052_v42 = vld [vmem:[%s3888_s0 + $0x1e0] sm:$0xff]  ;;  %v3001_v63 = vld [vmem:[%s3888_s0 + $0x48] sm:$0xff] }
  0x12   :  { %2888 = vmatmul.msk.bf16.vlgmr.msra.gmra.mxu0 %vm773_vm1, %v2992_v6  ;;  %2914 = vmatmul.msk.bf16.vlgmr.msra.gmra.mxu1 %vm773_vm1, %v3018_v7  ;;  %v3078_v43 = vld [vmem:[%s3888_s0 + $0x2b0] sm:$0xff]  ;;  %v3309_v44 = vld [vmem:[%s3890_s2] ss:$0 sm:$0xff]  ;;  %v3027_v0 = vld [vmem:[%s3888_s0 + $0x118] sm:$0xff] }
  0x13   :  { %2940 = vmatmul.msk.bf16.vlgmr.msra.gmra.mxu2 %vm773_vm1, %v3044_v8  ;;  %2966 = vmatmul.msk.bf16.vlgmr.msra.gmra.mxu3 %vm773_vm1, %v3070_v9  ;;  %v3053_v5 = vld [vmem:[%s3888_s0 + $0x1e8] sm:$0xff]  ;;  %v3079_v6 = vld [vmem:[%s3888_s0 + $0x2b8] sm:$0xff] }
  0x22   :  { %2889 = vmatmul.msk.bf16.gmra.mxu0 %vm773_vm1, %v2993_v10  ;;  %2915 = vmatmul.msk.bf16.gmra.mxu1 %vm773_vm1, %v3019_v11 }
  0x23   :  { %2941 = vmatmul.msk.bf16.gmra.mxu2 %vm773_vm1, %v3045_v12  ;;  %2967 = vmatmul.msk.bf16.gmra.mxu3 %vm773_vm1, %v3071_v13 }
  0x32   :  { %2890 = vmatmul.msk.bf16.gmra.mxu0 %vm773_vm1, %v2994_v14  ;;  %2916 = vmatmul.msk.bf16.gmra.mxu1 %vm773_vm1, %v3020_v15 }
  0x33   :  { %2942 = vmatmul.msk.bf16.gmra.mxu2 %vm773_vm1, %v3046_v16  ;;  %2968 = vmatmul.msk.bf16.gmra.mxu3 %vm773_vm1, %v3072_v17 }
  0x42   :  { %2891 = vmatmul.msk.bf16.gmra.mxu0 %vm773_vm1, %v2995_v18  ;;  %2917 = vmatmul.msk.bf16.gmra.mxu1 %vm773_vm1, %v3021_v19 }
  0x43   :  { %2943 = vmatmul.msk.bf16.gmra.mxu2 %vm773_vm1, %v3047_v20  ;;  %2969 = vmatmul.msk.bf16.gmra.mxu3 %vm773_vm1, %v3073_v21 }
  0x52   :  { %2892 = vmatmul.msk.bf16.gmra.mxu0 %vm773_vm1, %v2996_v22  ;;  %2918 = vmatmul.msk.bf16.gmra.mxu1 %vm773_vm1, %v3022_v23 }
  0x53   :  { %2944 = vmatmul.msk.bf16.gmra.mxu2 %vm773_vm1, %v3048_v24  ;;  %2970 = vmatmul.msk.bf16.gmra.mxu3 %vm773_vm1, %v3074_v25 }
  0x62   :  { %2893 = vmatmul.msk.bf16.gmra.mxu0 %vm773_vm1, %v2997_v26  ;;  %2919 = vmatmul.msk.bf16.gmra.mxu1 %vm773_vm1, %v3023_v27 }
  0x63   :  { %2945 = vmatmul.msk.bf16.gmra.mxu2 %vm773_vm1, %v3049_v28  ;;  %2971 = vmatmul.msk.bf16.gmra.mxu3 %vm773_vm1, %v3075_v29 }
  0x72   :  { %2894 = vmatmul.msk.bf16.gmra.mxu0 %vm773_vm1, %v2998_v30  ;;  %2920 = vmatmul.msk.bf16.gmra.mxu1 %vm773_vm1, %v3024_v31 }
  0x73   :  { %2946 = vmatmul.msk.bf16.gmra.mxu2 %vm773_vm1, %v3050_v32  ;;  %2972 = vmatmul.msk.bf16.gmra.mxu3 %vm773_vm1, %v3076_v33 }
  0x82   :  { %2895 = vmatmul.msk.bf16.gmra.mxu0 %vm773_vm1, %v2999_v34  ;;  %2921 = vmatmul.msk.bf16.gmra.mxu1 %vm773_vm1, %v3025_v35 }
  0x83   :  { %2947 = vmatmul.msk.bf16.gmra.mxu2 %vm773_vm1, %v3051_v36  ;;  %2973 = vmatmul.msk.bf16.gmra.mxu3 %vm773_vm1, %v3077_v37  ;;  %v3002_v37 = vld [vmem:[%s3888_s0 + $0x50] sm:$0xff] }
  0x8f   :  { %v1099_v40 = vpop.f32.mrf.mxu0  ;;  %v1229_v41 = vpop.f32.mrf.mxu1 }
  0x90   :  { %v1100_v45 = vadd.f32 %v3309_v44, %v1099_v40  ;;  %v1230_v46 = vadd.f32 %v3309_v44, %v1229_v41 }
  0x92   :  { %2896 = vmatmul.msk.bf16.gmra.mxu0 %vm773_vm1, %v3000_v38  ;;  %2922 = vmatmul.msk.bf16.gmra.mxu1 %vm773_vm1, %v3026_v39  ;;  %v1619_v53 = vmax.f32 %v1100_v45, 0.0  ;;  %v1671_v54 = vmax.f32 %v1230_v46, 0.0  ;;  %v3028_v38 = vld [vmem:[%s3888_s0 + $0x120] sm:$0xff] }
  0x93   :  { %2948 = vmatmul.msk.bf16.gmra.mxu2 %vm773_vm1, %v3052_v42  ;;  %2974 = vmatmul.msk.bf16.gmra.mxu3 %vm773_vm1, %v3078_v43  ;;  %v3054_v43 = vld [vmem:[%s3888_s0 + $0x1f0] sm:$0xff]  ;;  %v3080_v45 = vld [vmem:[%s3888_s0 + $0x2c0] sm:$0xff] }
  0x96   :  { %v1359_v47 = vpop.f32.mrf.mxu2  ;;  %v1489_v48 = vpop.f32.mrf.mxu3 }
  0x97   :  { %v1101_v49 = vpop.f32.mrf.mxu0  ;;  %v1231_v50 = vpop.f32.mrf.mxu1  ;;  %v1360_v59 = vadd.f32 %v3309_v44, %v1359_v47  ;;  %v1490_v60 = vadd.f32 %v3309_v44, %v1489_v48 }
  0x98   :  { %v1102_v51 = vadd.f32 %v3309_v44, %v1101_v49  ;;  %v1232_v52 = vadd.f32 %v3309_v44, %v1231_v50 }
  0x99   :  { %v1723_v9 = vmax.f32 %v1360_v59, 0.0  ;;  %v1775_v10 = vmax.f32 %v1490_v60, 0.0 }
  0x9a   :  { %v1620_v55 = vmax.f32 %v1102_v51, 0.0  ;;  %v1672_v56 = vmax.f32 %v1232_v52, 0.0 }
  0x9c   :  { %v2169_v57 = vadd.f32 %v1620_v55, %v1619_v53  ;;  %v2231_v58 = vadd.f32 %v1672_v56, %v1671_v54 }
  0x9e   :  { %v1361_v61 = vpop.f32.mrf.mxu2  ;;  %v1491_v62 = vpop.f32.mrf.mxu3 }
  0x9f   :  { %v1362_v1 = vadd.f32 %v3309_v44, %v1361_v61  ;;  %v1492_v2 = vadd.f32 %v3309_v44, %v1491_v62  ;;  %v1104_v3 = vpop.f32.mrf.mxu0  ;;  %v1234_v4 = vpop.f32.mrf.mxu1 }
  0xa0   :  { %v1105_v7 = vadd.f32 %v3309_v44, %v1104_v3  ;;  %v1235_v8 = vadd.f32 %v3309_v44, %v1234_v4 }
  0xa1   :  { %v1724_v11 = vmax.f32 %v1362_v1, 0.0  ;;  %v1776_v12 = vmax.f32 %v1492_v2, 0.0 }
  0xa2   :  { %v1621_v13 = vmax.f32 %v1105_v7, 0.0  ;;  %v1673_v14 = vmax.f32 %v1235_v8, 0.0  ;;  %2897 = vmatmul.msk.bf16.gmra.mxu0 %vm773_vm1, %v3001_v63  ;;  %2923 = vmatmul.msk.bf16.gmra.mxu1 %vm773_vm1, %v3027_v0 }
  0xa3   :  { %v2293_v15 = vadd.f32 %v1724_v11, %v1723_v9  ;;  %v2355_v16 = vadd.f32 %v1776_v12, %v1775_v10  ;;  %2949 = vmatmul.msk.bf16.gmra.mxu2 %vm773_vm1, %v3053_v5  ;;  %2975 = vmatmul.msk.bf16.gmra.mxu3 %vm773_vm1, %v3079_v6  ;;  %v3003_v10 = vld [vmem:[%s3888_s0 + $0x58] sm:$0xff]  ;;  %v3029_v11 = vld [vmem:[%s3888_s0 + $0x128] sm:$0xff] }
  0xa4   :  { %v2170_v17 = vadd.f32 %v2169_v57, %v1621_v13  ;;  %v2232_v18 = vadd.f32 %v2231_v58, %v1673_v14 }
  0xa6   :  { %v1364_v19 = vpop.f32.mrf.mxu2  ;;  %v1494_v20 = vpop.f32.mrf.mxu3 }
  0xa7   :  { %v1365_v21 = vadd.f32 %v3309_v44, %v1364_v19  ;;  %v1495_v22 = vadd.f32 %v3309_v44, %v1494_v20  ;;  %v1106_v23 = vpop.f32.mrf.mxu0  ;;  %v1236_v24 = vpop.f32.mrf.mxu1 }
  0xa8   :  { %v1107_v25 = vadd.f32 %v3309_v44, %v1106_v23  ;;  %v1237_v26 = vadd.f32 %v3309_v44, %v1236_v24 }
  0xa9   :  { %v1725_v27 = vmax.f32 %v1365_v21, 0.0  ;;  %v1777_v28 = vmax.f32 %v1495_v22, 0.0 }
  0xaa   :  { %v1622_v29 = vmax.f32 %v1107_v25, 0.0  ;;  %v1674_v30 = vmax.f32 %v1237_v26, 0.0 }
  0xab   :  { %v2294_v31 = vadd.f32 %v2293_v15, %v1725_v27  ;;  %v2356_v32 = vadd.f32 %v2355_v16, %v1777_v28  ;;  %v3055_v16 = vld [vmem:[%s3888_s0 + $0x1f8] sm:$0xff] }
  0xac   :  { %v2171_v33 = vadd.f32 %v2170_v17, %v1622_v29  ;;  %v2233_v34 = vadd.f32 %v2232_v18, %v1674_v30  ;;  %v3081_v17 = vld [vmem:[%s3888_s0 + $0x2c8] sm:$0xff] }
  0xae   :  { %v1366_v35 = vpop.f32.mrf.mxu2  ;;  %v1496_v36 = vpop.f32.mrf.mxu3 }
  0xaf   :  { %v1367_v39 = vadd.f32 %v3309_v44, %v1366_v35  ;;  %v1497_v40 = vadd.f32 %v3309_v44, %v1496_v36  ;;  %v1109_v41 = vpop.f32.mrf.mxu0  ;;  %v1239_v42 = vpop.f32.mrf.mxu1 }
  0xb0   :  { %v1110_v46 = vadd.f32 %v3309_v44, %v1109_v41  ;;  %v1240_v47 = vadd.f32 %v3309_v44, %v1239_v42 }
  0xb1   :  { %v1726_v48 = vmax.f32 %v1367_v39, 0.0  ;;  %v1778_v49 = vmax.f32 %v1497_v40, 0.0 }
  0xb2   :  { %v1623_v50 = vmax.f32 %v1110_v46, 0.0  ;;  %v1675_v51 = vmax.f32 %v1240_v47, 0.0  ;;  %2898 = vmatmul.msk.bf16.gmra.mxu0 %vm773_vm1, %v3002_v37  ;;  %2924 = vmatmul.msk.bf16.gmra.mxu1 %vm773_vm1, %v3028_v38  ;;  %v3004_v47 = vld [vmem:[%s3888_s0 + $0x60] sm:$0xff] }
  0xb3   :  { %v2295_v52 = vadd.f32 %v2294_v31, %v1726_v48  ;;  %v2357_v53 = vadd.f32 %v2356_v32, %v1778_v49  ;;  %2950 = vmatmul.msk.bf16.gmra.mxu2 %vm773_vm1, %v3054_v43  ;;  %2976 = vmatmul.msk.bf16.gmra.mxu3 %vm773_vm1, %v3080_v45  ;;  %v3030_v48 = vld [vmem:[%s3888_s0 + $0x130] sm:$0xff] }
  0xb4   :  { %v2172_v54 = vadd.f32 %v2171_v33, %v1623_v50  ;;  %v2234_v55 = vadd.f32 %v2233_v34, %v1675_v51 }
  0xb6   :  { %v1369_v56 = vpop.f32.mrf.mxu2  ;;  %v1499_v57 = vpop.f32.mrf.mxu3 }
  0xb7   :  { %v1370_v58 = vadd.f32 %v3309_v44, %v1369_v56  ;;  %v1500_v59 = vadd.f32 %v3309_v44, %v1499_v57  ;;  %v1111_v60 = vpop.f32.mrf.mxu0  ;;  %v1241_v61 = vpop.f32.mrf.mxu1 }
  0xb8   :  { %v1112_v62 = vadd.f32 %v3309_v44, %v1111_v60  ;;  %v1242_v63 = vadd.f32 %v3309_v44, %v1241_v61 }
  0xb9   :  { %v1727_v0 = vmax.f32 %v1370_v58, 0.0  ;;  %v1779_v1 = vmax.f32 %v1500_v59, 0.0 }
  0xba   :  { %v1624_v2 = vmax.f32 %v1112_v62, 0.0  ;;  %v1676_v3 = vmax.f32 %v1242_v63, 0.0 }
  0xbb   :  { %v2296_v4 = vadd.f32 %v2295_v52, %v1727_v0  ;;  %v2358_v5 = vadd.f32 %v2357_v53, %v1779_v1  ;;  %v3056_v53 = vld [vmem:[%s3888_s0 + $0x200] sm:$0xff] }
  0xbc   :  { %v2173_v6 = vadd.f32 %v2172_v54, %v1624_v2  ;;  %v2235_v7 = vadd.f32 %v2234_v55, %v1676_v3  ;;  %v3082_v54 = vld [vmem:[%s3888_s0 + $0x2d0] sm:$0xff] }
  0xbe   :  { %v1371_v8 = vpop.f32.mrf.mxu2  ;;  %v1501_v9 = vpop.f32.mrf.mxu3 }
  0xbf   :  { %v1372_v12 = vadd.f32 %v3309_v44, %v1371_v8  ;;  %v1502_v13 = vadd.f32 %v3309_v44, %v1501_v9  ;;  %v1114_v14 = vpop.f32.mrf.mxu0  ;;  %v1244_v15 = vpop.f32.mrf.mxu1 }
  0xc0   :  { %v1115_v18 = vadd.f32 %v3309_v44, %v1114_v14  ;;  %v1245_v19 = vadd.f32 %v3309_v44, %v1244_v15 }
  0xc1   :  { %v1728_v20 = vmax.f32 %v1372_v12, 0.0  ;;  %v1780_v21 = vmax.f32 %v1502_v13, 0.0 }
  0xc2   :  { %v1625_v22 = vmax.f32 %v1115_v18, 0.0  ;;  %v1677_v23 = vmax.f32 %v1245_v19, 0.0  ;;  %2899 = vmatmul.msk.bf16.gmra.mxu0 %vm773_vm1, %v3003_v10  ;;  %2925 = vmatmul.msk.bf16.gmra.mxu1 %vm773_vm1, %v3029_v11  ;;  %v3005_v19 = vld [vmem:[%s3888_s0 + $0x68] sm:$0xff] }
  0xc3   :  { %v2297_v24 = vadd.f32 %v2296_v4, %v1728_v20  ;;  %v2359_v25 = vadd.f32 %v2358_v5, %v1780_v21  ;;  %2951 = vmatmul.msk.bf16.gmra.mxu2 %vm773_vm1, %v3055_v16  ;;  %2977 = vmatmul.msk.bf16.gmra.mxu3 %vm773_vm1, %v3081_v17  ;;  %v3031_v20 = vld [vmem:[%s3888_s0 + $0x138] sm:$0xff] }
  0xc4   :  { %v2174_v26 = vadd.f32 %v2173_v6, %v1625_v22  ;;  %v2236_v27 = vadd.f32 %v2235_v7, %v1677_v23 }
  0xc6   :  { %v1374_v28 = vpop.f32.mrf.mxu2  ;;  %v1504_v29 = vpop.f32.mrf.mxu3 }
  0xc7   :  { %v1375_v30 = vadd.f32 %v3309_v44, %v1374_v28  ;;  %v1505_v31 = vadd.f32 %v3309_v44, %v1504_v29  ;;  %v1116_v32 = vpop.f32.mrf.mxu0  ;;  %v1246_v33 = vpop.f32.mrf.mxu1 }
  0xc8   :  { %v1117_v34 = vadd.f32 %v3309_v44, %v1116_v32  ;;  %v1247_v35 = vadd.f32 %v3309_v44, %v1246_v33 }
  0xc9   :  { %v1729_v36 = vmax.f32 %v1375_v30, 0.0  ;;  %v1781_v37 = vmax.f32 %v1505_v31, 0.0 }
  0xca   :  { %v1626_v38 = vmax.f32 %v1117_v34, 0.0  ;;  %v1678_v39 = vmax.f32 %v1247_v35, 0.0 }
  0xcb   :  { %v2298_v40 = vadd.f32 %v2297_v24, %v1729_v36  ;;  %v2360_v41 = vadd.f32 %v2359_v25, %v1781_v37  ;;  %v3057_v25 = vld [vmem:[%s3888_s0 + $0x208] sm:$0xff] }
  0xcc   :  { %v2175_v42 = vadd.f32 %v2174_v26, %v1626_v38  ;;  %v2237_v43 = vadd.f32 %v2236_v27, %v1678_v39  ;;  %v3083_v26 = vld [vmem:[%s3888_s0 + $0x2d8] sm:$0xff] }
  0xce   :  { %v1376_v45 = vpop.f32.mrf.mxu2  ;;  %v1506_v46 = vpop.f32.mrf.mxu3 }
  0xcf   :  { %v1377_v49 = vadd.f32 %v3309_v44, %v1376_v45  ;;  %v1507_v50 = vadd.f32 %v3309_v44, %v1506_v46  ;;  %v1119_v51 = vpop.f32.mrf.mxu0  ;;  %v1249_v52 = vpop.f32.mrf.mxu1 }
  0xd0   :  { %v1120_v55 = vadd.f32 %v3309_v44, %v1119_v51  ;;  %v1250_v56 = vadd.f32 %v3309_v44, %v1249_v52 }
  0xd1   :  { %v1730_v57 = vmax.f32 %v1377_v49, 0.0  ;;  %v1782_v58 = vmax.f32 %v1507_v50, 0.0 }
  0xd2   :  { %v1627_v59 = vmax.f32 %v1120_v55, 0.0  ;;  %v1679_v60 = vmax.f32 %v1250_v56, 0.0  ;;  %2900 = vmatmul.msk.bf16.gmra.mxu0 %vm773_vm1, %v3004_v47  ;;  %2926 = vmatmul.msk.bf16.gmra.mxu1 %vm773_vm1, %v3030_v48  ;;  %v3006_v56 = vld [vmem:[%s3888_s0 + $0x70] sm:$0xff] }
  0xd3   :  { %v2299_v61 = vadd.f32 %v2298_v40, %v1730_v57  ;;  %v2361_v62 = vadd.f32 %v2360_v41, %v1782_v58  ;;  %2952 = vmatmul.msk.bf16.gmra.mxu2 %vm773_vm1, %v3056_v53  ;;  %2978 = vmatmul.msk.bf16.gmra.mxu3 %vm773_vm1, %v3082_v54  ;;  %v3032_v57 = vld [vmem:[%s3888_s0 + $0x140] sm:$0xff] }
  0xd4   :  { %v2176_v63 = vadd.f32 %v2175_v42, %v1627_v59  ;;  %v2238_v0 = vadd.f32 %v2237_v43, %v1679_v60 }
  0xd6   :  { %v1379_v1 = vpop.f32.mrf.mxu2  ;;  %v1509_v2 = vpop.f32.mrf.mxu3 }
  0xd7   :  { %v1380_v3 = vadd.f32 %v3309_v44, %v1379_v1  ;;  %v1510_v4 = vadd.f32 %v3309_v44, %v1509_v2  ;;  %v1121_v5 = vpop.f32.mrf.mxu0  ;;  %v1251_v6 = vpop.f32.mrf.mxu1 }
  0xd8   :  { %v1122_v7 = vadd.f32 %v3309_v44, %v1121_v5  ;;  %v1252_v8 = vadd.f32 %v3309_v44, %v1251_v6 }
  0xd9   :  { %v1731_v9 = vmax.f32 %v1380_v3, 0.0  ;;  %v1783_v10 = vmax.f32 %v1510_v4, 0.0 }
  0xda   :  { %v1628_v11 = vmax.f32 %v1122_v7, 0.0  ;;  %v1680_v12 = vmax.f32 %v1252_v8, 0.0 }
  0xdb   :  { %v2300_v13 = vadd.f32 %v2299_v61, %v1731_v9  ;;  %v2362_v14 = vadd.f32 %v2361_v62, %v1783_v10  ;;  %v3058_v62 = vld [vmem:[%s3888_s0 + $0x210] sm:$0xff] }
  0xdc   :  { %v2177_v15 = vadd.f32 %v2176_v63, %v1628_v11  ;;  %v2239_v16 = vadd.f32 %v2238_v0, %v1680_v12  ;;  %v3084_v63 = vld [vmem:[%s3888_s0 + $0x2e0] sm:$0xff] }
  0xde   :  { %v1381_v17 = vpop.f32.mrf.mxu2  ;;  %v1511_v18 = vpop.f32.mrf.mxu3 }
  0xdf   :  { %v1382_v21 = vadd.f32 %v3309_v44, %v1381_v17  ;;  %v1512_v22 = vadd.f32 %v3309_v44, %v1511_v18  ;;  %v1124_v23 = vpop.f32.mrf.mxu0  ;;  %v1254_v24 = vpop.f32.mrf.mxu1 }
  0xe0   :  { %v1125_v27 = vadd.f32 %v3309_v44, %v1124_v23  ;;  %v1255_v28 = vadd.f32 %v3309_v44, %v1254_v24 }
  0xe1   :  { %v1732_v29 = vmax.f32 %v1382_v21, 0.0  ;;  %v1784_v30 = vmax.f32 %v1512_v22, 0.0 }
  0xe2   :  { %v1629_v31 = vmax.f32 %v1125_v27, 0.0  ;;  %v1681_v32 = vmax.f32 %v1255_v28, 0.0  ;;  %2901 = vmatmul.msk.bf16.gmra.mxu0 %vm773_vm1, %v3005_v19  ;;  %2927 = vmatmul.msk.bf16.gmra.mxu1 %vm773_vm1, %v3031_v20  ;;  %v3007_v28 = vld [vmem:[%s3888_s0 + $0x78] sm:$0xff] }
  0xe3   :  { %v2301_v33 = vadd.f32 %v2300_v13, %v1732_v29  ;;  %v2363_v34 = vadd.f32 %v2362_v14, %v1784_v30  ;;  %2953 = vmatmul.msk.bf16.gmra.mxu2 %vm773_vm1, %v3057_v25  ;;  %2979 = vmatmul.msk.bf16.gmra.mxu3 %vm773_vm1, %v3083_v26  ;;  %v3033_v29 = vld [vmem:[%s3888_s0 + $0x148] sm:$0xff] }
  0xe4   :  { %v2178_v35 = vadd.f32 %v2177_v15, %v1629_v31  ;;  %v2240_v36 = vadd.f32 %v2239_v16, %v1681_v32 }
  0xe6   :  { %v1384_v37 = vpop.f32.mrf.mxu2  ;;  %v1514_v38 = vpop.f32.mrf.mxu3 }
  0xe7   :  { %v1385_v39 = vadd.f32 %v3309_v44, %v1384_v37  ;;  %v1515_v40 = vadd.f32 %v3309_v44, %v1514_v38  ;;  %v1126_v41 = vpop.f32.mrf.mxu0  ;;  %v1256_v42 = vpop.f32.mrf.mxu1 }
  0xe8   :  { %v1127_v43 = vadd.f32 %v3309_v44, %v1126_v41  ;;  %v1257_v45 = vadd.f32 %v3309_v44, %v1256_v42 }
  0xe9   :  { %v1733_v46 = vmax.f32 %v1385_v39, 0.0  ;;  %v1785_v47 = vmax.f32 %v1515_v40, 0.0 }
  0xea   :  { %v1630_v48 = vmax.f32 %v1127_v43, 0.0  ;;  %v1682_v49 = vmax.f32 %v1257_v45, 0.0 }
  0xeb   :  { %v2302_v50 = vadd.f32 %v2301_v33, %v1733_v46  ;;  %v2364_v51 = vadd.f32 %v2363_v34, %v1785_v47  ;;  %v3059_v34 = vld [vmem:[%s3888_s0 + $0x218] sm:$0xff] }
  0xec   :  { %v2179_v52 = vadd.f32 %v2178_v35, %v1630_v48  ;;  %v2241_v53 = vadd.f32 %v2240_v36, %v1682_v49  ;;  %v3085_v35 = vld [vmem:[%s3888_s0 + $0x2e8] sm:$0xff] }
  0xee   :  { %v1386_v54 = vpop.f32.mrf.mxu2  ;;  %v1516_v55 = vpop.f32.mrf.mxu3 }
  0xef   :  { %v1387_v58 = vadd.f32 %v3309_v44, %v1386_v54  ;;  %v1517_v59 = vadd.f32 %v3309_v44, %v1516_v55  ;;  %v1129_v60 = vpop.f32.mrf.mxu0  ;;  %v1259_v61 = vpop.f32.mrf.mxu1 }
  0xf0   :  { %v1130_v0 = vadd.f32 %v3309_v44, %v1129_v60  ;;  %v1260_v1 = vadd.f32 %v3309_v44, %v1259_v61 }
  0xf1   :  { %v1734_v2 = vmax.f32 %v1387_v58, 0.0  ;;  %v1786_v3 = vmax.f32 %v1517_v59, 0.0 }
  0xf2   :  { %v1631_v4 = vmax.f32 %v1130_v0, 0.0  ;;  %v1683_v5 = vmax.f32 %v1260_v1, 0.0  ;;  %2902 = vmatmul.msk.bf16.gmra.mxu0 %vm773_vm1, %v3006_v56  ;;  %2928 = vmatmul.msk.bf16.gmra.mxu1 %vm773_vm1, %v3032_v57  ;;  %v3008_v1 = vld [vmem:[%s3888_s0 + $0x80] sm:$0xff] }
  0xf3   :  { %v2303_v6 = vadd.f32 %v2302_v50, %v1734_v2  ;;  %v2365_v7 = vadd.f32 %v2364_v51, %v1786_v3  ;;  %2954 = vmatmul.msk.bf16.gmra.mxu2 %vm773_vm1, %v3058_v62  ;;  %2980 = vmatmul.msk.bf16.gmra.mxu3 %vm773_vm1, %v3084_v63  ;;  %v3034_v2 = vld [vmem:[%s3888_s0 + $0x150] sm:$0xff] }
  0xf4   :  { %v2180_v8 = vadd.f32 %v2179_v52, %v1631_v4  ;;  %v2242_v9 = vadd.f32 %v2241_v53, %v1683_v5 }
  0xf6   :  { %v1389_v10 = vpop.f32.mrf.mxu2  ;;  %v1519_v11 = vpop.f32.mrf.mxu3 }
  0xf7   :  { %v1390_v12 = vadd.f32 %v3309_v44, %v1389_v10  ;;  %v1520_v13 = vadd.f32 %v3309_v44, %v1519_v11  ;;  %v1131_v14 = vpop.f32.mrf.mxu0  ;;  %v1261_v15 = vpop.f32.mrf.mxu1 }
  0xf8   :  { %v1132_v16 = vadd.f32 %v3309_v44, %v1131_v14  ;;  %v1262_v17 = vadd.f32 %v3309_v44, %v1261_v15 }
  0xf9   :  { %v1735_v18 = vmax.f32 %v1390_v12, 0.0  ;;  %v1787_v19 = vmax.f32 %v1520_v13, 0.0 }
  0xfa   :  { %v1632_v20 = vmax.f32 %v1132_v16, 0.0  ;;  %v1684_v21 = vmax.f32 %v1262_v17, 0.0 }
  0xfb   :  { %v2304_v22 = vadd.f32 %v2303_v6, %v1735_v18  ;;  %v2366_v23 = vadd.f32 %v2365_v7, %v1787_v19  ;;  %v3060_v7 = vld [vmem:[%s3888_s0 + $0x220] sm:$0xff] }
  0xfc   :  { %v2181_v24 = vadd.f32 %v2180_v8, %v1632_v20  ;;  %v2243_v25 = vadd.f32 %v2242_v9, %v1684_v21  ;;  %v3086_v8 = vld [vmem:[%s3888_s0 + $0x2f0] sm:$0xff] }
  0xfe   :  { %v1391_v26 = vpop.f32.mrf.mxu2  ;;  %v1521_v27 = vpop.f32.mrf.mxu3 }
  0xff   :  { %v1392_v30 = vadd.f32 %v3309_v44, %v1391_v26  ;;  %v1522_v31 = vadd.f32 %v3309_v44, %v1521_v27  ;;  %v1134_v32 = vpop.f32.mrf.mxu0  ;;  %v1264_v33 = vpop.f32.mrf.mxu1 }
 0x100   :  { %v1135_v36 = vadd.f32 %v3309_v44, %v1134_v32  ;;  %v1265_v37 = vadd.f32 %v3309_v44, %v1264_v33 }
 0x101   :  { %v1736_v38 = vmax.f32 %v1392_v30, 0.0  ;;  %v1788_v39 = vmax.f32 %v1522_v31, 0.0 }
 0x102   :  { %v1633_v40 = vmax.f32 %v1135_v36, 0.0  ;;  %v1685_v41 = vmax.f32 %v1265_v37, 0.0  ;;  %2903 = vmatmul.msk.bf16.gmra.mxu0 %vm773_vm1, %v3007_v28  ;;  %2929 = vmatmul.msk.bf16.gmra.mxu1 %vm773_vm1, %v3033_v29  ;;  %v3009_v37 = vld [vmem:[%s3888_s0 + $0x88] sm:$0xff] }
 0x103   :  { %v2305_v42 = vadd.f32 %v2304_v22, %v1736_v38  ;;  %v2367_v43 = vadd.f32 %v2366_v23, %v1788_v39  ;;  %2955 = vmatmul.msk.bf16.gmra.mxu2 %vm773_vm1, %v3059_v34  ;;  %2981 = vmatmul.msk.bf16.gmra.mxu3 %vm773_vm1, %v3085_v35  ;;  %v3035_v38 = vld [vmem:[%s3888_s0 + $0x158] sm:$0xff] }
 0x104   :  { %v2182_v45 = vadd.f32 %v2181_v24, %v1633_v40  ;;  %v2244_v46 = vadd.f32 %v2243_v25, %v1685_v41 }
 0x106   :  { %v1394_v47 = vpop.f32.mrf.mxu2  ;;  %v1524_v48 = vpop.f32.mrf.mxu3 }
 0x107   :  { %v1395_v49 = vadd.f32 %v3309_v44, %v1394_v47  ;;  %v1525_v50 = vadd.f32 %v3309_v44, %v1524_v48  ;;  %v1136_v51 = vpop.f32.mrf.mxu0  ;;  %v1266_v52 = vpop.f32.mrf.mxu1 }
 0x108   :  { %v1137_v53 = vadd.f32 %v3309_v44, %v1136_v51  ;;  %v1267_v54 = vadd.f32 %v3309_v44, %v1266_v52 }
 0x109   :  { %v1737_v55 = vmax.f32 %v1395_v49, 0.0  ;;  %v1789_v56 = vmax.f32 %v1525_v50, 0.0 }
 0x10a   :  { %v1634_v57 = vmax.f32 %v1137_v53, 0.0  ;;  %v1686_v58 = vmax.f32 %v1267_v54, 0.0 }
 0x10b   :  { %v2306_v59 = vadd.f32 %v2305_v42, %v1737_v55  ;;  %v2368_v60 = vadd.f32 %v2367_v43, %v1789_v56  ;;  %v3061_v43 = vld [vmem:[%s3888_s0 + $0x228] sm:$0xff] }
 0x10c   :  { %v2183_v61 = vadd.f32 %v2182_v45, %v1634_v57  ;;  %v2245_v62 = vadd.f32 %v2244_v46, %v1686_v58  ;;  %v3087_v45 = vld [vmem:[%s3888_s0 + $0x2f8] sm:$0xff] }
 0x10e   :  { %v1396_v63 = vpop.f32.mrf.mxu2  ;;  %v1526_v0 = vpop.f32.mrf.mxu3 }
 0x10f   :  { %v1397_v3 = vadd.f32 %v3309_v44, %v1396_v63  ;;  %v1527_v4 = vadd.f32 %v3309_v44, %v1526_v0  ;;  %v1139_v5 = vpop.f32.mrf.mxu0  ;;  %v1269_v6 = vpop.f32.mrf.mxu1 }
 0x110   :  { %v1140_v9 = vadd.f32 %v3309_v44, %v1139_v5  ;;  %v1270_v10 = vadd.f32 %v3309_v44, %v1269_v6 }
 0x111   :  { %v1738_v11 = vmax.f32 %v1397_v3, 0.0  ;;  %v1790_v12 = vmax.f32 %v1527_v4, 0.0 }
 0x112   :  { %v1635_v13 = vmax.f32 %v1140_v9, 0.0  ;;  %v1687_v14 = vmax.f32 %v1270_v10, 0.0  ;;  %2904 = vmatmul.msk.bf16.gmra.mxu0 %vm773_vm1, %v3008_v1  ;;  %2930 = vmatmul.msk.bf16.gmra.mxu1 %vm773_vm1, %v3034_v2  ;;  %v3010_v10 = vld [vmem:[%s3888_s0 + $0x90] sm:$0xff] }
 0x113   :  { %v2307_v15 = vadd.f32 %v2306_v59, %v1738_v11  ;;  %v2369_v16 = vadd.f32 %v2368_v60, %v1790_v12  ;;  %2956 = vmatmul.msk.bf16.gmra.mxu2 %vm773_vm1, %v3060_v7  ;;  %2982 = vmatmul.msk.bf16.gmra.mxu3 %vm773_vm1, %v3086_v8  ;;  %v3036_v11 = vld [vmem:[%s3888_s0 + $0x160] sm:$0xff] }
 0x114   :  { %v2184_v17 = vadd.f32 %v2183_v61, %v1635_v13  ;;  %v2246_v18 = vadd.f32 %v2245_v62, %v1687_v14 }
 0x116   :  { %v1399_v19 = vpop.f32.mrf.mxu2  ;;  %v1529_v20 = vpop.f32.mrf.mxu3 }
 0x117   :  { %v1400_v21 = vadd.f32 %v3309_v44, %v1399_v19  ;;  %v1530_v22 = vadd.f32 %v3309_v44, %v1529_v20  ;;  %v1141_v23 = vpop.f32.mrf.mxu0  ;;  %v1271_v24 = vpop.f32.mrf.mxu1 }
 0x118   :  { %v1142_v25 = vadd.f32 %v3309_v44, %v1141_v23  ;;  %v1272_v26 = vadd.f32 %v3309_v44, %v1271_v24 }
 0x119   :  { %v1739_v27 = vmax.f32 %v1400_v21, 0.0  ;;  %v1791_v28 = vmax.f32 %v1530_v22, 0.0 }
 0x11a   :  { %v1636_v29 = vmax.f32 %v1142_v25, 0.0  ;;  %v1688_v30 = vmax.f32 %v1272_v26, 0.0 }
 0x11b   :  { %v2308_v31 = vadd.f32 %v2307_v15, %v1739_v27  ;;  %v2370_v32 = vadd.f32 %v2369_v16, %v1791_v28  ;;  %v3062_v16 = vld [vmem:[%s3888_s0 + $0x230] sm:$0xff] }
 0x11c   :  { %v2185_v33 = vadd.f32 %v2184_v17, %v1636_v29  ;;  %v2247_v34 = vadd.f32 %v2246_v18, %v1688_v30  ;;  %v3088_v17 = vld [vmem:[%s3888_s0 + $0x300] sm:$0xff] }
 0x11e   :  { %v1401_v35 = vpop.f32.mrf.mxu2  ;;  %v1531_v36 = vpop.f32.mrf.mxu3 }
 0x11f   :  { %v1402_v39 = vadd.f32 %v3309_v44, %v1401_v35  ;;  %v1532_v40 = vadd.f32 %v3309_v44, %v1531_v36  ;;  %v1144_v41 = vpop.f32.mrf.mxu0  ;;  %v1274_v42 = vpop.f32.mrf.mxu1 }
 0x120   :  { %v1145_v46 = vadd.f32 %v3309_v44, %v1144_v41  ;;  %v1275_v47 = vadd.f32 %v3309_v44, %v1274_v42 }
 0x121   :  { %v1740_v48 = vmax.f32 %v1402_v39, 0.0  ;;  %v1792_v49 = vmax.f32 %v1532_v40, 0.0 }
 0x122   :  { %v1637_v50 = vmax.f32 %v1145_v46, 0.0  ;;  %v1689_v51 = vmax.f32 %v1275_v47, 0.0  ;;  %2905 = vmatmul.msk.bf16.gmra.mxu0 %vm773_vm1, %v3009_v37  ;;  %2931 = vmatmul.msk.bf16.gmra.mxu1 %vm773_vm1, %v3035_v38  ;;  %v3011_v47 = vld [vmem:[%s3888_s0 + $0x98] sm:$0xff] }
 0x123   :  { %v2309_v52 = vadd.f32 %v2308_v31, %v1740_v48  ;;  %v2371_v53 = vadd.f32 %v2370_v32, %v1792_v49  ;;  %2957 = vmatmul.msk.bf16.gmra.mxu2 %vm773_vm1, %v3061_v43  ;;  %2983 = vmatmul.msk.bf16.gmra.mxu3 %vm773_vm1, %v3087_v45  ;;  %v3037_v48 = vld [vmem:[%s3888_s0 + $0x168] sm:$0xff] }
 0x124   :  { %v2186_v54 = vadd.f32 %v2185_v33, %v1637_v50  ;;  %v2248_v55 = vadd.f32 %v2247_v34, %v1689_v51 }
 0x126   :  { %v1404_v56 = vpop.f32.mrf.mxu2  ;;  %v1534_v57 = vpop.f32.mrf.mxu3 }
 0x127   :  { %v1405_v58 = vadd.f32 %v3309_v44, %v1404_v56  ;;  %v1535_v59 = vadd.f32 %v3309_v44, %v1534_v57  ;;  %v1146_v60 = vpop.f32.mrf.mxu0  ;;  %v1276_v61 = vpop.f32.mrf.mxu1 }
 0x128   :  { %v1147_v62 = vadd.f32 %v3309_v44, %v1146_v60  ;;  %v1277_v63 = vadd.f32 %v3309_v44, %v1276_v61 }
 0x129   :  { %v1741_v0 = vmax.f32 %v1405_v58, 0.0  ;;  %v1793_v1 = vmax.f32 %v1535_v59, 0.0 }
 0x12a   :  { %v1638_v2 = vmax.f32 %v1147_v62, 0.0  ;;  %v1690_v3 = vmax.f32 %v1277_v63, 0.0 }
 0x12b   :  { %v2310_v4 = vadd.f32 %v2309_v52, %v1741_v0  ;;  %v2372_v5 = vadd.f32 %v2371_v53, %v1793_v1  ;;  %v3063_v53 = vld [vmem:[%s3888_s0 + $0x238] sm:$0xff]  ;;  %v1827_v1 = vlaneseq }
 0x12c   :  { %v2187_v6 = vadd.f32 %v2186_v54, %v1638_v2  ;;  %v2249_v7 = vadd.f32 %v2248_v55, %v1690_v3  ;;  %v3089_v54 = vld [vmem:[%s3888_s0 + $0x308] sm:$0xff] }
 0x12e   :  { %v1406_v8 = vpop.f32.mrf.mxu2  ;;  %v1536_v9 = vpop.f32.mrf.mxu3 }
 0x12f   :  { %v1407_v12 = vadd.f32 %v3309_v44, %v1406_v8  ;;  %v1537_v13 = vadd.f32 %v3309_v44, %v1536_v9  ;;  %v1149_v14 = vpop.f32.mrf.mxu0  ;;  %v1279_v15 = vpop.f32.mrf.mxu1 }
 0x130   :  { %v1150_v18 = vadd.f32 %v3309_v44, %v1149_v14  ;;  %v1280_v19 = vadd.f32 %v3309_v44, %v1279_v15 }
 0x131   :  { %v1742_v20 = vmax.f32 %v1407_v12, 0.0  ;;  %v1794_v21 = vmax.f32 %v1537_v13, 0.0  ;;  %v1828_v12 = vshrl.u32 %v1827_v1, 7 }
 0x132   :  { %v1639_v22 = vmax.f32 %v1150_v18, 0.0  ;;  %v1691_v23 = vmax.f32 %v1280_v19, 0.0  ;;  %2906 = vmatmul.msk.bf16.gmra.mxu0 %vm773_vm1, %v3010_v10  ;;  %2932 = vmatmul.msk.bf16.gmra.mxu1 %vm773_vm1, %v3036_v11 }
 0x133   :  { %v2311_v24 = vadd.f32 %v2310_v4, %v1742_v20  ;;  %v2373_v25 = vadd.f32 %v2372_v5, %v1794_v21  ;;  %2958 = vmatmul.msk.bf16.gmra.mxu2 %vm773_vm1, %v3062_v16  ;;  %2984 = vmatmul.msk.bf16.gmra.mxu3 %vm773_vm1, %v3088_v17  ;;  %v3585_v19 = vadd.s32 192, %v1828_v12 }
 0x134   :  { %v2188_v26 = vadd.f32 %v2187_v6, %v1639_v22  ;;  %v2250_v27 = vadd.f32 %v2249_v7, %v1691_v23  ;;  %v3012_v22 = vld [vmem:[%s3888_s0 + $0xa0] sm:$0xff]  ;;  %v3038_v23 = vld [vmem:[%s3888_s0 + $0x170] sm:$0xff] }
 0x135   :  { %vm1906_vm2 = vcmp.lt.s32.totalorder %v3585_v19, 196 }
 0x136   :  { %v1409_v28 = vpop.f32.mrf.mxu2  ;;  %v1539_v29 = vpop.f32.mrf.mxu3 }
 0x137   :  { %v1410_v30 = vadd.f32 %v3309_v44, %v1409_v28  ;;  %v1540_v31 = vadd.f32 %v3309_v44, %v1539_v29  ;;  %v1151_v32 = vpop.f32.mrf.mxu0  ;;  %v1281_v33 = vpop.f32.mrf.mxu1  ;;  %v3064_v28 = vld [vmem:[%s3888_s0 + $0x240] sm:$0xff]  ;;  %v3090_v29 = vld [vmem:[%s3888_s0 + $0x310] sm:$0xff] }
 0x138   :  { %v1152_v34 = vadd.f32 %v3309_v44, %v1151_v32  ;;  %v1282_v35 = vadd.f32 %v3309_v44, %v1281_v33 }
 0x139   :  { %v1743_v36 = vmax.f32 %v1410_v30, 0.0  ;;  %v1795_v37 = vmax.f32 %v1540_v31, 0.0 }
 0x13a   :  { %v1640_v38 = vmax.f32 %v1152_v34, 0.0  ;;  %v1692_v39 = vmax.f32 %v1282_v35, 0.0 }
 0x13b   :  { %v2312_v40 = vadd.f32 %v2311_v24, %v1743_v36  ;;  %v2374_v41 = vadd.f32 %v2373_v25, %v1795_v37 }
 0x13c   :  { %v2189_v42 = vadd.f32 %v2188_v26, %v1640_v38  ;;  %v2251_v43 = vadd.f32 %v2250_v27, %v1692_v39 }
 0x13e   :  { %v1411_v45 = vpop.f32.mrf.mxu2  ;;  %v1541_v46 = vpop.f32.mrf.mxu3 }
 0x13f   :  { %v1412_v49 = vadd.f32 %v3309_v44, %v1411_v45  ;;  %v1542_v50 = vadd.f32 %v3309_v44, %v1541_v46  ;;  %v1154_v51 = vpop.f32.mrf.mxu0  ;;  %v1284_v52 = vpop.f32.mrf.mxu1 }
 0x140   :  { %v1155_v55 = vadd.f32 %v3309_v44, %v1154_v51  ;;  %v1285_v56 = vadd.f32 %v3309_v44, %v1284_v52 }
 0x141   :  { %v1744_v57 = vmax.f32 %v1412_v49, 0.0  ;;  %v1796_v58 = vmax.f32 %v1542_v50, 0.0 }
 0x142   :  { %v1641_v59 = vmax.f32 %v1155_v55, 0.0  ;;  %v1693_v60 = vmax.f32 %v1285_v56, 0.0  ;;  %2907 = vmatmul.msk.bf16.gmra.mxu0 %vm773_vm1, %v3011_v47  ;;  %2933 = vmatmul.msk.bf16.gmra.mxu1 %vm773_vm1, %v3037_v48 }
 0x143   :  { %v2313_v61 = vadd.f32 %v2312_v40, %v1744_v57  ;;  %v2375_v62 = vadd.f32 %v2374_v41, %v1796_v58  ;;  %2959 = vmatmul.msk.bf16.gmra.mxu2 %vm773_vm1, %v3063_v53  ;;  %2985 = vmatmul.msk.bf16.gmra.mxu3 %vm773_vm1, %v3089_v54  ;;  %v3039_v57 = vld [vmem:[%s3888_s0 + $0x178] sm:$0xff] }
 0x144   :  { %v2190_v63 = vadd.f32 %v2189_v42, %v1641_v59  ;;  %v2252_v0 = vadd.f32 %v2251_v43, %v1693_v60  ;;  %v3065_v60 = vld [vmem:[%s3888_s0 + $0x248] sm:$0xff] }
 0x146   :  { %v1414_v2 = vpop.f32.mrf.mxu2  ;;  %v1544_v3 = vpop.f32.mrf.mxu3 }
 0x147   :  { %v1415_v4 = vadd.f32 %v3309_v44, %v1414_v2  ;;  %v1545_v5 = vadd.f32 %v3309_v44, %v1544_v3  ;;  %v1156_v6 = vpop.f32.mrf.mxu0  ;;  %v1286_v7 = vpop.f32.mrf.mxu1 }
 0x148   :  { %v1157_v8 = vadd.f32 %v3309_v44, %v1156_v6  ;;  %v1287_v9 = vadd.f32 %v3309_v44, %v1286_v7 }
 0x149   :  { %v1745_v10 = vmax.f32 %v1415_v4, 0.0  ;;  %v1797_v11 = vmax.f32 %v1545_v5, 0.0 }
 0x14a   :  { %v1642_v13 = vmax.f32 %v1157_v8, 0.0  ;;  %v1694_v14 = vmax.f32 %v1287_v9, 0.0 }
 0x14b   :  { %v2314_v15 = vadd.f32 %v2313_v61, %v1745_v10  ;;  %v2376_v16 = vadd.f32 %v2375_v62, %v1797_v11  ;;  %v3091_v61 = vld [vmem:[%s3888_s0 + $0x318] sm:$0xff]  ;;  %v3645_v62 = vld [vmem:[%s3890_s2] ss:$0 sm:$0xff] }
 0x14c   :  { %v2191_v17 = vadd.f32 %v2190_v63, %v1642_v13  ;;  %v2253_v18 = vadd.f32 %v2252_v0, %v1694_v14 }
 0x14e   :  { %v1416_v20 = vpop.f32.mrf.mxu2  ;;  %v1546_v21 = vpop.f32.mrf.mxu3 }
 0x14f   :  { %v1417_v24 = vadd.f32 %v3309_v44, %v1416_v20  ;;  %v1547_v25 = vadd.f32 %v3309_v44, %v1546_v21  ;;  %v1159_v26 = vpop.f32.mrf.mxu0  ;;  %v1289_v27 = vpop.f32.mrf.mxu1 }
 0x150   :  { %v1160_v30 = vadd.f32 %v3309_v44, %v1159_v26  ;;  %v1290_v31 = vadd.f32 %v3309_v44, %v1289_v27 }
 0x151   :  { %v1746_v32 = vmax.f32 %v1417_v24, 0.0  ;;  %v1798_v33 = vmax.f32 %v1547_v25, 0.0  ;;  %v3066_v24 = vld [vmem:[%s3888_s0 + $0x250] sm:$0xff]  ;;  %v3092_v25 = vld [vmem:[%s3888_s0 + $0x320] sm:$0xff] }
 0x152   :  { %v1643_v34 = vmax.f32 %v1160_v30, 0.0  ;;  %v1695_v35 = vmax.f32 %v1290_v31, 0.0  ;;  %2908 = vmatmul.msk.bf16.gmra.mxu0 %vm773_vm1, %v3012_v22  ;;  %2934 = vmatmul.msk.bf16.gmra.mxu1 %vm773_vm1, %v3038_v23 }
 0x153   :  { %v2315_v36 = vadd.f32 %v2314_v15, %v1746_v32  ;;  %v2377_v37 = vadd.f32 %v2376_v16, %v1798_v33  ;;  %2960 = vmatmul.msk.bf16.gmra.mxu2 %vm773_vm1, %v3064_v28  ;;  %2986 = vmatmul.msk.bf16.gmra.mxu3 %vm773_vm1, %v3090_v29 }
 0x154   :  { %v1984_v38 = vsel %vm1906_vm2, %v1643_v34, 0.0  ;;  %v2036_v39 = vsel %vm1906_vm2, %v1695_v35, 0.0 }
 0x155   :  { %v3612_v40 = vadd.f32 %v2191_v17, %v1984_v38  ;;  %v3614_v41 = vadd.f32 %v2253_v18, %v2036_v39  ;;  %v3014_v17 = vld [vmem:[%s3888_s0 + $0xb0] sm:$0xff]  ;;  %v3040_v18 = vld [vmem:[%s3888_s0 + $0x180] sm:$0xff] }
 0x156   :  { %v1419_v42 = vpop.f32.mrf.mxu2  ;;  %v1549_v43 = vpop.f32.mrf.mxu3 }
 0x157   :  { %v1420_v45 = vadd.f32 %v3309_v44, %v1419_v42  ;;  %v1550_v46 = vadd.f32 %v3309_v44, %v1549_v43  ;;  %v1161_v47 = vpop.f32.mrf.mxu0  ;;  %v1291_v48 = vpop.f32.mrf.mxu1  ;;  %v3013_v44 = vld [vmem:[%s3888_s0 + $0xa8] sm:$0xff] }
 0x159   :  { %v1747_v49 = vmax.f32 %v1420_v45, 0.0  ;;  %v1799_v50 = vmax.f32 %v1550_v46, 0.0 }
 0x15b   :  { %v2088_v51 = vsel %vm1906_vm2, %v1747_v49, 0.0  ;;  %v2140_v52 = vsel %vm1906_vm2, %v1799_v50, 0.0 }
 0x15c   :  { %v3622_v53 = vadd.f32 %v2315_v36, %v2088_v51  ;;  %v3624_v54 = vadd.f32 %v2377_v37, %v2140_v52 }
 0x15e   :  { %v1421_v55 = vpop.f32.mrf.mxu2  ;;  %v1551_v56 = vpop.f32.mrf.mxu3 }
 0x15f   :  { %v1164_v58 = vpop.f32.mrf.mxu0  ;;  %v1294_v59 = vpop.f32.mrf.mxu1 }
 0x160   :  { %v1165_v63 = vadd.f32 %v3645_v62, %v1164_v58  ;;  %v1295_v0 = vadd.f32 %v3645_v62, %v1294_v59 }
 0x162   :  { %2909 = vmatmul.msk.bf16.gmra.mxu0 %vm773_vm1, %v3013_v44  ;;  %2935 = vmatmul.msk.bf16.gmra.mxu1 %vm773_vm1, %v3039_v57  ;;  %v1645_v7 = vmax.f32 %v1165_v63, 0.0  ;;  %v1697_v8 = vmax.f32 %v1295_v0, 0.0 }
 0x163   :  { %2961 = vmatmul.msk.bf16.gmra.mxu2 %vm773_vm1, %v3065_v60  ;;  %2987 = vmatmul.msk.bf16.gmra.mxu3 %vm773_vm1, %v3091_v61  ;;  %v3015_v60 = vld [vmem:[%s3888_s0 + $0xb8] sm:$0xff]  ;;  %v3041_v61 = vld [vmem:[%s3888_s0 + $0x188] sm:$0xff] }
 0x166   :  { %v1424_v1 = vpop.f32.mrf.mxu2  ;;  %v1554_v2 = vpop.f32.mrf.mxu3 }
 0x167   :  { %v1166_v3 = vpop.f32.mrf.mxu0  ;;  %v1296_v4 = vpop.f32.mrf.mxu1  ;;  %v1425_v13 = vadd.f32 %v3645_v62, %v1424_v1  ;;  %v1555_v14 = vadd.f32 %v3645_v62, %v1554_v2 }
 0x168   :  { %v1167_v5 = vadd.f32 %v3645_v62, %v1166_v3  ;;  %v1297_v6 = vadd.f32 %v3645_v62, %v1296_v4  ;;  %v3067_v3 = vld [vmem:[%s3888_s0 + $0x258] sm:$0xff]  ;;  %v3093_v4 = vld [vmem:[%s3888_s0 + $0x328] sm:$0xff] }
 0x169   :  { %v1749_v28 = vmax.f32 %v1425_v13, 0.0  ;;  %v1801_v29 = vmax.f32 %v1555_v14, 0.0 }
 0x16a   :  { %v1646_v9 = vmax.f32 %v1167_v5, 0.0  ;;  %v1698_v10 = vmax.f32 %v1297_v6, 0.0 }
 0x16c   :  { %v2200_v11 = vadd.f32 %v1646_v9, %v1645_v7  ;;  %v2262_v12 = vadd.f32 %v1698_v10, %v1697_v8 }
 0x16e   :  { %v1426_v15 = vpop.f32.mrf.mxu2  ;;  %v1556_v16 = vpop.f32.mrf.mxu3 }
 0x16f   :  { %v1427_v20 = vadd.f32 %v3645_v62, %v1426_v15  ;;  %v1557_v21 = vadd.f32 %v3645_v62, %v1556_v16  ;;  %v1169_v22 = vpop.f32.mrf.mxu0  ;;  %v1299_v23 = vpop.f32.mrf.mxu1 }
 0x170   :  { %v1170_v26 = vadd.f32 %v3645_v62, %v1169_v22  ;;  %v1300_v27 = vadd.f32 %v3645_v62, %v1299_v23 }
 0x171   :  { %v1750_v30 = vmax.f32 %v1427_v20, 0.0  ;;  %v1802_v31 = vmax.f32 %v1557_v21, 0.0 }
 0x172   :  { %v1647_v32 = vmax.f32 %v1170_v26, 0.0  ;;  %v1699_v33 = vmax.f32 %v1300_v27, 0.0  ;;  %2910 = vmatmul.msk.bf16.gmra.mxu0 %vm773_vm1, %v3014_v17  ;;  %2936 = vmatmul.msk.bf16.gmra.mxu1 %vm773_vm1, %v3040_v18 }
 0x173   :  { %v2324_v34 = vadd.f32 %v1750_v30, %v1749_v28  ;;  %v2386_v35 = vadd.f32 %v1802_v31, %v1801_v29  ;;  %2962 = vmatmul.msk.bf16.gmra.mxu2 %vm773_vm1, %v3066_v24  ;;  %2988 = vmatmul.msk.bf16.gmra.mxu3 %vm773_vm1, %v3092_v25 }
 0x174   :  { %v2201_v36 = vadd.f32 %v2200_v11, %v1647_v32  ;;  %v2263_v37 = vadd.f32 %v2262_v12, %v1699_v33 }
 0x176   :  { %v1429_v38 = vpop.f32.mrf.mxu2  ;;  %v1559_v39 = vpop.f32.mrf.mxu3 }
 0x177   :  { %v1430_v42 = vadd.f32 %v3645_v62, %v1429_v38  ;;  %v1560_v43 = vadd.f32 %v3645_v62, %v1559_v39  ;;  %v1171_v45 = vpop.f32.mrf.mxu0  ;;  %v1301_v46 = vpop.f32.mrf.mxu1 }
 0x178   :  { %v1172_v47 = vadd.f32 %v3645_v62, %v1171_v45  ;;  %v1302_v48 = vadd.f32 %v3645_v62, %v1301_v46 }
 0x179   :  { %v1751_v49 = vmax.f32 %v1430_v42, 0.0  ;;  %v1803_v50 = vmax.f32 %v1560_v43, 0.0  ;;  %v3068_v42 = vld [vmem:[%s3888_s0 + $0x260] sm:$0xff]  ;;  %v3094_v43 = vld [vmem:[%s3888_s0 + $0x330] sm:$0xff] }
 0x17a   :  { %v1648_v51 = vmax.f32 %v1172_v47, 0.0  ;;  %v1700_v52 = vmax.f32 %v1302_v48, 0.0 }
 0x17b   :  { %v2325_v55 = vadd.f32 %v2324_v34, %v1751_v49  ;;  %v2387_v56 = vadd.f32 %v2386_v35, %v1803_v50  ;;  %v3016_v34 = vld [vmem:[%s3888_s0 + $0xc0] sm:$0xff]  ;;  %v3042_v35 = vld [vmem:[%s3888_s0 + $0x190] sm:$0xff] }
 0x17c   :  { %v2202_v44 = vadd.f32 %v2201_v36, %v1648_v51  ;;  %v2264_v57 = vadd.f32 %v2263_v37, %v1700_v52 }
 0x17e   :  { %v1431_v58 = vpop.f32.mrf.mxu2  ;;  %v1561_v59 = vpop.f32.mrf.mxu3 }
 0x17f   :  { %v1432_v63 = vadd.f32 %v3645_v62, %v1431_v58  ;;  %v1562_v0 = vadd.f32 %v3645_v62, %v1561_v59  ;;  %v1174_v1 = vpop.f32.mrf.mxu0  ;;  %v1304_v2 = vpop.f32.mrf.mxu1 }
 0x180   :  { %v1175_v5 = vadd.f32 %v3645_v62, %v1174_v1  ;;  %v1305_v6 = vadd.f32 %v3645_v62, %v1304_v2 }
 0x181   :  { %v1752_v7 = vmax.f32 %v1432_v63, 0.0  ;;  %v1804_v8 = vmax.f32 %v1562_v0, 0.0 }
 0x182   :  { %v1649_v9 = vmax.f32 %v1175_v5, 0.0  ;;  %v1701_v10 = vmax.f32 %v1305_v6, 0.0  ;;  %2911 = vmatmul.msk.bf16.gmra.mxu0 %vm773_vm1, %v3015_v60  ;;  %2937 = vmatmul.msk.bf16.gmra.mxu1 %vm773_vm1, %v3041_v61 }
 0x183   :  { %v2326_v11 = vadd.f32 %v2325_v55, %v1752_v7  ;;  %v2388_v12 = vadd.f32 %v2387_v56, %v1804_v8  ;;  %2963 = vmatmul.msk.bf16.gmra.mxu2 %vm773_vm1, %v3067_v3  ;;  %2989 = vmatmul.msk.bf16.gmra.mxu3 %vm773_vm1, %v3093_v4 }
 0x184   :  { %v2203_v13 = vadd.f32 %v2202_v44, %v1649_v9  ;;  %v2265_v14 = vadd.f32 %v2264_v57, %v1701_v10 }
 0x186   :  { %v1434_v15 = vpop.f32.mrf.mxu2  ;;  %v1564_v16 = vpop.f32.mrf.mxu3 }
 0x187   :  { %v1435_v17 = vadd.f32 %v3645_v62, %v1434_v15  ;;  %v1565_v18 = vadd.f32 %v3645_v62, %v1564_v16  ;;  %v1176_v20 = vpop.f32.mrf.mxu0  ;;  %v1306_v21 = vpop.f32.mrf.mxu1 }
 0x188   :  { %v1177_v22 = vadd.f32 %v3645_v62, %v1176_v20  ;;  %v1307_v23 = vadd.f32 %v3645_v62, %v1306_v21 }
 0x189   :  { %v1753_v24 = vmax.f32 %v1435_v17, 0.0  ;;  %v1805_v25 = vmax.f32 %v1565_v18, 0.0  ;;  %v3069_v17 = vld [vmem:[%s3888_s0 + $0x268] sm:$0xff]  ;;  %v3095_v18 = vld [vmem:[%s3888_s0 + $0x338] sm:$0xff] }
 0x18a   :  { %v1650_v26 = vmax.f32 %v1177_v22, 0.0  ;;  %v1702_v27 = vmax.f32 %v1307_v23, 0.0 }
 0x18b   :  { %v2327_v28 = vadd.f32 %v2326_v11, %v1753_v24  ;;  %v2389_v29 = vadd.f32 %v2388_v12, %v1805_v25  ;;  %v3017_v11 = vld [vmem:[%s3888_s0 + $0xc8] sm:$0xff]  ;;  %v3043_v12 = vld [vmem:[%s3888_s0 + $0x198] sm:$0xff]  ;;  %s3136_s0 = smov [#allocation3]  }
 0x18c   :  { %v2204_v30 = vadd.f32 %v2203_v13, %v1650_v26  ;;  %v2266_v31 = vadd.f32 %v2265_v14, %v1702_v27  ;;  %s2453_s4 = sshll.u32 %s3136_s0, 4  ;;  %s2454_s4 = int_to_ptr.vmem [resolvable:$true] %s2453_s4 }
 0x18e   :  { %v1436_v32 = vpop.f32.mrf.mxu2  ;;  %v1566_v33 = vpop.f32.mrf.mxu3 }
 0x18f   :  { %v1437_v36 = vadd.f32 %v3645_v62, %v1436_v32  ;;  %v1567_v37 = vadd.f32 %v3645_v62, %v1566_v33  ;;  %v1179_v38 = vpop.f32.mrf.mxu0  ;;  %v1309_v39 = vpop.f32.mrf.mxu1 }
 0x190   :  { %v1180_v45 = vadd.f32 %v3645_v62, %v1179_v38  ;;  %v1310_v46 = vadd.f32 %v3645_v62, %v1309_v39 }
 0x191   :  { %v1754_v47 = vmax.f32 %v1437_v36, 0.0  ;;  %v1806_v48 = vmax.f32 %v1567_v37, 0.0 }
 0x192   :  { %v1651_v49 = vmax.f32 %v1180_v45, 0.0  ;;  %v1703_v50 = vmax.f32 %v1310_v46, 0.0  ;;  %2912 = vmatmul.msk.bf16.gmra.mxu0 %vm773_vm1, %v3016_v34  ;;  %2938 = vmatmul.msk.bf16.gmra.mxu1 %vm773_vm1, %v3042_v35 }
 0x193   :  { %v2328_v51 = vadd.f32 %v2327_v28, %v1754_v47  ;;  %v2390_v52 = vadd.f32 %v2389_v29, %v1806_v48  ;;  %2964 = vmatmul.msk.bf16.gmra.mxu2 %vm773_vm1, %v3068_v42  ;;  %2990 = vmatmul.msk.bf16.gmra.mxu3 %vm773_vm1, %v3094_v43 }
 0x194   :  { %v2205_v55 = vadd.f32 %v2204_v30, %v1651_v49  ;;  %v2267_v56 = vadd.f32 %v2266_v31, %v1703_v50 }
 0x196   :  { %v1439_v44 = vpop.f32.mrf.mxu2  ;;  %v1569_v57 = vpop.f32.mrf.mxu3 }
 0x197   :  { %v1440_v58 = vadd.f32 %v3645_v62, %v1439_v44  ;;  %v1570_v59 = vadd.f32 %v3645_v62, %v1569_v57  ;;  %v1181_v60 = vpop.f32.mrf.mxu0  ;;  %v1311_v61 = vpop.f32.mrf.mxu1 }
 0x198   :  { %v1182_v63 = vadd.f32 %v3645_v62, %v1181_v60  ;;  %v1312_v0 = vadd.f32 %v3645_v62, %v1311_v61 }
 0x199   :  { %v1755_v1 = vmax.f32 %v1440_v58, 0.0  ;;  %v1807_v2 = vmax.f32 %v1570_v59, 0.0 }
 0x19a   :  { %v1652_v3 = vmax.f32 %v1182_v63, 0.0  ;;  %v1704_v4 = vmax.f32 %v1312_v0, 0.0 }
 0x19b   :  { %v2329_v5 = vadd.f32 %v2328_v51, %v1755_v1  ;;  %v2391_v6 = vadd.f32 %v2390_v52, %v1807_v2 }
 0x19c   :  { %v2206_v7 = vadd.f32 %v2205_v55, %v1652_v3  ;;  %v2268_v8 = vadd.f32 %v2267_v56, %v1704_v4 }
 0x19e   :  { %v1441_v9 = vpop.f32.mrf.mxu2  ;;  %v1571_v10 = vpop.f32.mrf.mxu3 }
 0x19f   :  { %v1442_v13 = vadd.f32 %v3645_v62, %v1441_v9  ;;  %v1572_v14 = vadd.f32 %v3645_v62, %v1571_v10  ;;  %v1184_v15 = vpop.f32.mrf.mxu0  ;;  %v1314_v16 = vpop.f32.mrf.mxu1 }
 0x1a0   :  { %v1185_v20 = vadd.f32 %v3645_v62, %v1184_v15  ;;  %v1315_v21 = vadd.f32 %v3645_v62, %v1314_v16 }
 0x1a1   :  { %v1756_v22 = vmax.f32 %v1442_v13, 0.0  ;;  %v1808_v23 = vmax.f32 %v1572_v14, 0.0 }
 0x1a2   :  { %v1653_v24 = vmax.f32 %v1185_v20, 0.0  ;;  %v1705_v25 = vmax.f32 %v1315_v21, 0.0  ;;  %2913 = vmatmul.msk.bf16.gmra.mxu0 %vm773_vm1, %v3017_v11  ;;  %2939 = vmatmul.msk.bf16.gmra.mxu1 %vm773_vm1, %v3043_v12 }
 0x1a3   :  { %v2330_v26 = vadd.f32 %v2329_v5, %v1756_v22  ;;  %v2392_v27 = vadd.f32 %v2391_v6, %v1808_v23  ;;  %2965 = vmatmul.msk.bf16.gmra.mxu2 %vm773_vm1, %v3069_v17  ;;  %2991 = vmatmul.msk.bf16.gmra.mxu3 %vm773_vm1, %v3095_v18 }
 0x1a4   :  { %v2207_v28 = vadd.f32 %v2206_v7, %v1653_v24  ;;  %v2269_v29 = vadd.f32 %v2268_v8, %v1705_v25 }
 0x1a6   :  { %v1444_v30 = vpop.f32.mrf.mxu2  ;;  %v1574_v31 = vpop.f32.mrf.mxu3 }
 0x1a7   :  { %v1445_v32 = vadd.f32 %v3645_v62, %v1444_v30  ;;  %v1575_v33 = vadd.f32 %v3645_v62, %v1574_v31  ;;  %v1186_v34 = vpop.f32.mrf.mxu0  ;;  %v1316_v35 = vpop.f32.mrf.mxu1 }
 0x1a8   :  { %v1187_v36 = vadd.f32 %v3645_v62, %v1186_v34  ;;  %v1317_v37 = vadd.f32 %v3645_v62, %v1316_v35 }
 0x1a9   :  { %v1757_v38 = vmax.f32 %v1445_v32, 0.0  ;;  %v1809_v39 = vmax.f32 %v1575_v33, 0.0 }
 0x1aa   :  { %v1654_v42 = vmax.f32 %v1187_v36, 0.0  ;;  %v1706_v43 = vmax.f32 %v1317_v37, 0.0 }
 0x1ab   :  { %v2331_v45 = vadd.f32 %v2330_v26, %v1757_v38  ;;  %v2393_v46 = vadd.f32 %v2392_v27, %v1809_v39 }
 0x1ac   :  { %v2208_v47 = vadd.f32 %v2207_v28, %v1654_v42  ;;  %v2270_v48 = vadd.f32 %v2269_v29, %v1706_v43 }
 0x1ae   :  { %v1446_v49 = vpop.f32.mrf.mxu2  ;;  %v1576_v50 = vpop.f32.mrf.mxu3 }
 0x1af   :  { %v1447_v51 = vadd.f32 %v3645_v62, %v1446_v49  ;;  %v1577_v52 = vadd.f32 %v3645_v62, %v1576_v50  ;;  %v1189_v55 = vpop.f32.mrf.mxu0  ;;  %v1319_v56 = vpop.f32.mrf.mxu1 }
 0x1b0   :  { %v1190_v44 = vadd.f32 %v3645_v62, %v1189_v55  ;;  %v1320_v57 = vadd.f32 %v3645_v62, %v1319_v56 }
 0x1b1   :  { %v1758_v58 = vmax.f32 %v1447_v51, 0.0  ;;  %v1810_v59 = vmax.f32 %v1577_v52, 0.0 }
 0x1b2   :  { %v1655_v60 = vmax.f32 %v1190_v44, 0.0  ;;  %v1707_v61 = vmax.f32 %v1320_v57, 0.0 }
 0x1b3   :  { %v2332_v63 = vadd.f32 %v2331_v45, %v1758_v58  ;;  %v2394_v0 = vadd.f32 %v2393_v46, %v1810_v59 }
 0x1b4   :  { %v2209_v1 = vadd.f32 %v2208_v47, %v1655_v60  ;;  %v2271_v2 = vadd.f32 %v2270_v48, %v1707_v61 }
 0x1b6   :  { %v1449_v3 = vpop.f32.mrf.mxu2  ;;  %v1579_v4 = vpop.f32.mrf.mxu3 }
 0x1b7   :  { %v1450_v5 = vadd.f32 %v3645_v62, %v1449_v3  ;;  %v1580_v6 = vadd.f32 %v3645_v62, %v1579_v4  ;;  %v1191_v7 = vpop.f32.mrf.mxu0  ;;  %v1321_v8 = vpop.f32.mrf.mxu1 }
 0x1b8   :  { %v1192_v9 = vadd.f32 %v3645_v62, %v1191_v7  ;;  %v1322_v10 = vadd.f32 %v3645_v62, %v1321_v8 }
 0x1b9   :  { %v1759_v11 = vmax.f32 %v1450_v5, 0.0  ;;  %v1811_v12 = vmax.f32 %v1580_v6, 0.0 }
 0x1ba   :  { %v1656_v13 = vmax.f32 %v1192_v9, 0.0  ;;  %v1708_v14 = vmax.f32 %v1322_v10, 0.0 }
 0x1bb   :  { %v2333_v15 = vadd.f32 %v2332_v63, %v1759_v11  ;;  %v2395_v16 = vadd.f32 %v2394_v0, %v1811_v12 }
 0x1bc   :  { %v2210_v17 = vadd.f32 %v2209_v1, %v1656_v13  ;;  %v2272_v18 = vadd.f32 %v2271_v2, %v1708_v14 }
 0x1be   :  { %v1451_v20 = vpop.f32.mrf.mxu2  ;;  %v1581_v21 = vpop.f32.mrf.mxu3 }
 0x1bf   :  { %v1452_v22 = vadd.f32 %v3645_v62, %v1451_v20  ;;  %v1582_v23 = vadd.f32 %v3645_v62, %v1581_v21  ;;  %v1194_v24 = vpop.f32.mrf.mxu0  ;;  %v1324_v25 = vpop.f32.mrf.mxu1 }
 0x1c0   :  { %v1195_v26 = vadd.f32 %v3645_v62, %v1194_v24  ;;  %v1325_v27 = vadd.f32 %v3645_v62, %v1324_v25 }
 0x1c1   :  { %v1760_v28 = vmax.f32 %v1452_v22, 0.0  ;;  %v1812_v29 = vmax.f32 %v1582_v23, 0.0 }
 0x1c2   :  { %v1657_v30 = vmax.f32 %v1195_v26, 0.0  ;;  %v1709_v31 = vmax.f32 %v1325_v27, 0.0 }
 0x1c3   :  { %v2334_v32 = vadd.f32 %v2333_v15, %v1760_v28  ;;  %v2396_v33 = vadd.f32 %v2395_v16, %v1812_v29 }
 0x1c4   :  { %v2211_v34 = vadd.f32 %v2210_v17, %v1657_v30  ;;  %v2273_v35 = vadd.f32 %v2272_v18, %v1709_v31 }
 0x1c6   :  { %v1454_v36 = vpop.f32.mrf.mxu2  ;;  %v1584_v37 = vpop.f32.mrf.mxu3 }
 0x1c7   :  { %v1455_v38 = vadd.f32 %v3645_v62, %v1454_v36  ;;  %v1585_v39 = vadd.f32 %v3645_v62, %v1584_v37  ;;  %v1196_v42 = vpop.f32.mrf.mxu0  ;;  %v1326_v43 = vpop.f32.mrf.mxu1 }
 0x1c8   :  { %v1197_v45 = vadd.f32 %v3645_v62, %v1196_v42  ;;  %v1327_v46 = vadd.f32 %v3645_v62, %v1326_v43  ;;  %v2318_v43 = vrot.slane %v3622_v53, 4 }
 0x1c9   :  { %v1761_v47 = vmax.f32 %v1455_v38, 0.0  ;;  %v1813_v48 = vmax.f32 %v1585_v39, 0.0  ;;  %v2256_v38 = vrot.slane %v3614_v41, 4 }
 0x1ca   :  { %v1658_v49 = vmax.f32 %v1197_v45, 0.0  ;;  %v1710_v50 = vmax.f32 %v1327_v46, 0.0 }
 0x1cb   :  { %v2335_v51 = vadd.f32 %v2334_v32, %v1761_v47  ;;  %v2397_v52 = vadd.f32 %v2396_v33, %v1813_v48 }
 0x1cc   :  { %v2212_v55 = vadd.f32 %v2211_v34, %v1658_v49  ;;  %v2274_v56 = vadd.f32 %v2273_v35, %v1710_v50  ;;  %v2194_v34 = vrot.slane %v3612_v40, 4 }
 0x1ce   :  { %v1456_v44 = vpop.f32.mrf.mxu2  ;;  %v1586_v57 = vpop.f32.mrf.mxu3  ;;  %v3789_v37 = vadd.f32 %v2194_v34, %v3612_v40 }
 0x1cf   :  { %v1457_v58 = vadd.f32 %v3645_v62, %v1456_v44  ;;  %v1587_v59 = vadd.f32 %v3645_v62, %v1586_v57  ;;  %v1199_v60 = vpop.f32.mrf.mxu0  ;;  %v1329_v61 = vpop.f32.mrf.mxu1  ;;  %v3812_v57 = vadd.f32 %v2318_v43, %v3622_v53 }
 0x1d0   :  { %v1200_v63 = vadd.f32 %v3645_v62, %v1199_v60  ;;  %v1330_v0 = vadd.f32 %v3645_v62, %v1329_v61 }
 0x1d1   :  { %v1762_v1 = vmax.f32 %v1457_v58, 0.0  ;;  %v1814_v2 = vmax.f32 %v1587_v59, 0.0  ;;  %v2380_v58 = vrot.slane %v3624_v54, 4 }
 0x1d2   :  { %v1659_v3 = vmax.f32 %v1200_v63, 0.0  ;;  %v1711_v4 = vmax.f32 %v1330_v0, 0.0 }
 0x1d3   :  { %v2336_v5 = vadd.f32 %v2335_v51, %v1762_v1  ;;  %v2398_v6 = vadd.f32 %v2397_v52, %v1814_v2  ;;  %v2196_v52 = vrot.slane %v3789_v37, 2 }
 0x1d4   :  { %v3769_v7 = vadd.f32 %v2212_v55, %v1659_v3  ;;  %v3771_v8 = vadd.f32 %v2274_v56, %v1711_v4  ;;  %v3807_v55 = vadd.f32 %v2256_v38, %v3614_v41 }
 0x1d6   :  { %v1459_v9 = vpop.f32.mrf.mxu2  ;;  %v1589_v10 = vpop.f32.mrf.mxu3 }
 0x1d7   :  { %v1201_v11 = vpop.f32.mrf.mxu0  ;;  %v1331_v12 = vpop.f32.mrf.mxu1  ;;  %v1460_v35 = vadd.f32 %v3645_v62, %v1459_v9  ;;  %v1590_v36 = vadd.f32 %v3645_v62, %v1589_v10 }
 0x1d8   :  { %v1202_v47 = vadd.f32 %v3645_v62, %v1201_v11  ;;  %v1332_v48 = vadd.f32 %v3645_v62, %v1331_v12 }
 0x1d9   :  { %v1763_v50 = vmax.f32 %v1460_v35, 0.0  ;;  %v1815_v51 = vmax.f32 %v1590_v36, 0.0 }
 0x1da   :  { %v1660_v61 = vmax.f32 %v1202_v47, 0.0  ;;  %v1712_v63 = vmax.f32 %v1332_v48, 0.0 }
 0x1db   :  { %v2337_v2 = vadd.f32 %v2336_v5, %v1763_v50  ;;  %v2399_v41 = vadd.f32 %v2398_v6, %v1815_v51 }
 0x1de   :  { %v1461_v13 = vpop.f32.mrf.mxu2  ;;  %v1591_v14 = vpop.f32.mrf.mxu3 }
 0x1df   :  { %v1204_v15 = vpop.f32.mrf.mxu0  ;;  %v1334_v16 = vpop.f32.mrf.mxu1  ;;  %v1462_v49 = vadd.f32 %v3645_v62, %v1461_v13  ;;  %v1592_v40 = vadd.f32 %v3645_v62, %v1591_v14 }
 0x1e0   :  { %v1205_v56 = vadd.f32 %v3645_v62, %v1204_v15  ;;  %v1335_v44 = vadd.f32 %v3645_v62, %v1334_v16 }
 0x1e1   :  { %v1764_v0 = vmax.f32 %v1462_v49, 0.0  ;;  %v1816_v1 = vmax.f32 %v1592_v40, 0.0 }
 0x1e2   :  { %v1661_v9 = vmax.f32 %v1205_v56, 0.0  ;;  %v1713_v10 = vmax.f32 %v1335_v44, 0.0 }
 0x1e6   :  { %v1464_v17 = vpop.f32.mrf.mxu2  ;;  %v1594_v18 = vpop.f32.mrf.mxu3 }
 0x1e7   :  { %v1206_v20 = vpop.f32.mrf.mxu0  ;;  %v1336_v21 = vpop.f32.mrf.mxu1  ;;  %v1465_v59 = vadd.f32 %v3645_v62, %v1464_v17  ;;  %v1595_v60 = vadd.f32 %v3645_v62, %v1594_v18  ;;  %v2214_v18 = vadd.f32 %v3769_v7, %v1660_v61 }
 0x1e8   :  { %v1207_v3 = vadd.f32 %v3645_v62, %v1206_v20  ;;  %v1337_v4 = vadd.f32 %v3645_v62, %v1336_v21  ;;  %v2276_v20 = vadd.f32 %v3771_v8, %v1712_v63  ;;  %v2338_v21 = vadd.f32 %v2337_v2, %v1764_v0 }
 0x1e9   :  { %v1765_v14 = vmax.f32 %v1465_v59, 0.0  ;;  %v1817_v15 = vmax.f32 %v1595_v60, 0.0  ;;  %v2215_v38 = vadd.f32 %v2214_v18, %v1661_v9 }
 0x1ea   :  { %v1662_v34 = vmax.f32 %v1207_v3, 0.0  ;;  %v2277_v43 = vadd.f32 %v2276_v20, %v1713_v10 }
 0x1eb   :  { %v2339_v48 = vadd.f32 %v2338_v21, %v1765_v14 }
 0x1ee   :  { %v1466_v22 = vpop.f32.mrf.mxu2  ;;  %v1596_v23 = vpop.f32.mrf.mxu3 }
 0x1ef   :  { %v1209_v24 = vpop.f32.mrf.mxu0  ;;  %v1339_v25 = vpop.f32.mrf.mxu1  ;;  %v1467_v53 = vadd.f32 %v3645_v62, %v1466_v22  ;;  %v1597_v11 = vadd.f32 %v3645_v62, %v1596_v23  ;;  %v2400_v22 = vadd.f32 %v2399_v41, %v1816_v1  ;;  %v1714_v23 = vmax.f32 %v1337_v4, 0.0 }
 0x1f0   :  { %v1210_v16 = vadd.f32 %v3645_v62, %v1209_v24  ;;  %v1340_v5 = vadd.f32 %v3645_v62, %v1339_v25 }
 0x1f1   :  { %v1766_v47 = vmax.f32 %v1467_v53, 0.0  ;;  %v1818_v24 = vmax.f32 %v1597_v11, 0.0  ;;  %v2401_v25 = vadd.f32 %v2400_v22, %v1817_v15  ;;  %v2278_v51 = vadd.f32 %v2277_v43, %v1714_v23 }
 0x1f2   :  { %v1663_v49 = vmax.f32 %v1210_v16, 0.0  ;;  %v1715_v40 = vmax.f32 %v1340_v5, 0.0 }
 0x1f3   :  { %v2340_v59 = vadd.f32 %v2339_v48, %v1766_v47  ;;  %v2402_v60 = vadd.f32 %v2401_v25, %v1818_v24 }
 0x1f4   :  { %v2279_v1 = vadd.f32 %v2278_v51, %v1715_v40 }
 0x1f6   :  { %v3773_v26 = vpop.f32.mrf.mxu2  ;;  %v3775_v27 = vpop.f32.mrf.mxu3 }
 0x1f7   :  { %v1211_v28 = vpop.f32.mrf.mxu0  ;;  %v1341_v29 = vpop.f32.mrf.mxu1  ;;  %v1470_v7 = vadd.f32 %v3645_v62, %v3773_v26  ;;  %v1600_v8 = vadd.f32 %v3645_v62, %v3775_v27 }
 0x1f8   :  { %v1212_v35 = vadd.f32 %v3645_v62, %v1211_v28  ;;  %v1342_v36 = vadd.f32 %v3645_v62, %v1341_v29  ;;  %v2216_v29 = vadd.f32 %v2215_v38, %v1662_v34 }
 0x1f9   :  { %v1767_v3 = vmax.f32 %v1470_v7, 0.0  ;;  %v1819_v4 = vmax.f32 %v1600_v8, 0.0 }
 0x1fa   :  { %v1664_v56 = vmax.f32 %v1212_v35, 0.0  ;;  %v1716_v44 = vmax.f32 %v1342_v36, 0.0  ;;  %v2217_v0 = vadd.f32 %v2216_v29, %v1663_v49 }
 0x1fb   :  { %v2341_v21 = vadd.f32 %v2340_v59, %v1767_v3  ;;  %v2403_v22 = vadd.f32 %v2402_v60, %v1819_v4  ;;  %v2197_v3 = vadd.f32 %v2196_v52, %v3789_v37  ;;  %v2258_v4 = vrot.slane %v3807_v55, 2 }
 0x1fc   :  { %v2280_v53 = vadd.f32 %v2279_v1, %v1716_v44  ;;  %v2320_v37 = vrot.slane %v3812_v57, 2  ;;  %v2381_v52 = vadd.f32 %v2380_v58, %v3624_v54 }
 0x1fe   :  { %v3777_v30 = vpop.f32.mrf.mxu2  ;;  %v3779_v31 = vpop.f32.mrf.mxu3  ;;  %v2321_v54 = vadd.f32 %v2320_v37, %v3812_v57 }
 0x1ff   :  { %v3781_v32 = vpop.f32.mrf.mxu0  ;;  %v3783_v33 = vpop.f32.mrf.mxu1  ;;  %v1472_v61 = vadd.f32 %v3645_v62, %v3777_v30  ;;  %v1602_v26 = vadd.f32 %v3645_v62, %v3779_v31  ;;  %v2218_v30 = vadd.f32 %v2217_v0, %v1664_v56 }
 0x200   :  { %v1215_v50 = vadd.f32 %v3645_v62, %v3781_v32  ;;  %v1345_v28 = vadd.f32 %v3645_v62, %v3783_v33 }
 0x201   :  { %v1768_v14 = vmax.f32 %v1472_v61, 0.0  ;;  %v1820_v15 = vmax.f32 %v1602_v26, 0.0 }
 0x202   :  { %v1665_v9 = vmax.f32 %v1215_v50, 0.0  ;;  %v1717_v10 = vmax.f32 %v1345_v28, 0.0 }
 0x203   :  { %v2342_v36 = vadd.f32 %v2341_v21, %v1768_v14 }
 0x204   :  { %v2219_v34 = vadd.f32 %v2218_v30, %v1665_v9 }
 0x206   :  { %v3792_v39 = vpop.f32.mrf.mxu2  ;;  %v3794_v42 = vpop.f32.mrf.mxu3 }
 0x207   :  { %v3797_v45 = vpop.f32.mrf.mxu0  ;;  %v3799_v46 = vpop.f32.mrf.mxu1 }
 0x208   :  { %v1217_v32 = vadd.f32 %v3645_v62, %v3797_v45  ;;  %v1347_v33 = vadd.f32 %v3645_v62, %v3799_v46  ;;  %v1475_v45 = vadd.f32 %v3645_v62, %v3792_v39  ;;  %v1605_v46 = vadd.f32 %v3645_v62, %v3794_v42 }
 0x209   :  { %v2404_v42 = vadd.f32 %v2403_v22, %v1820_v15 }
 0x20a   :  { %v1666_v16 = vmax.f32 %v1217_v32, 0.0  ;;  %v1718_v5 = vmax.f32 %v1347_v33, 0.0  ;;  %v1769_v38 = vmax.f32 %v1475_v45, 0.0  ;;  %v1821_v43 = vmax.f32 %v1605_v46, 0.0 }
 0x20c   :  { %v2220_v48 = vadd.f32 %v2219_v34, %v1666_v16  ;;  %v2343_v0 = vadd.f32 %v2342_v36, %v1769_v38  ;;  %v2405_v1 = vadd.f32 %v2404_v42, %v1821_v43 }
 0x20e   :  { %v3821_v12 = vpop.f32.mrf.mxu2  ;;  %v3823_v13 = vpop.f32.mrf.mxu3 }
 0x20f   :  { %v1219_v6 = vpop.f32.mrf.mxu0  ;;  %v1349_v17 = vpop.f32.mrf.mxu1  ;;  %v1607_v23 = vadd.f32 %v3645_v62, %v3823_v13 }
 0x210   :  { %v1220_v31 = vadd.f32 %v3645_v62, %v1219_v6  ;;  %v1350_v11 = vadd.f32 %v3645_v62, %v1349_v17  ;;  %v2281_v6 = vadd.f32 %v2280_v53, %v1717_v10  ;;  %v1477_v17 = vadd.f32 %v3645_v62, %v3821_v12 }
 0x211   :  { %v1822_v51 = vmax.f32 %v1607_v23, 0.0 }
 0x212   :  { %v1667_v39 = vmax.f32 %v1220_v31, 0.0  ;;  %v1719_v35 = vmax.f32 %v1350_v11, 0.0  ;;  %v2282_v25 = vadd.f32 %v2281_v6, %v1718_v5  ;;  %v1770_v29 = vmax.f32 %v1477_v17, 0.0 }
 0x213   :  { %v2406_v53 = vadd.f32 %v2405_v1, %v1822_v51 }
 0x214   :  { %v2221_v56 = vadd.f32 %v2220_v48, %v1667_v39  ;;  %v2283_v44 = vadd.f32 %v2282_v25, %v1719_v35  ;;  %v2344_v30 = vadd.f32 %v2343_v0, %v1770_v29  ;;  %v2259_v39 = vadd.f32 %v2258_v4, %v3807_v55 }
 0x215   :  { %v2382_v48 = vrot.slane %v2381_v52, 2 }
 0x216   :  { %v1479_v63 = vpop.f32.mrf.mxu2  ;;  %v1609_v27 = vpop.f32.mrf.mxu3 }
 0x217   :  { %v1221_v2 = vpop.f32.mrf.mxu0  ;;  %v1351_v41 = vpop.f32.mrf.mxu1  ;;  %v1480_v50 = vadd.f32 %v3645_v62, %v1479_v63  ;;  %v1610_v12 = vadd.f32 %v3645_v62, %v1609_v27 }
 0x218   :  { %v1222_v18 = vadd.f32 %v3645_v62, %v1221_v2  ;;  %v1352_v20 = vadd.f32 %v3645_v62, %v1351_v41 }
 0x219   :  { %v1771_v33 = vmax.f32 %v1480_v50, 0.0  ;;  %v1823_v27 = vmax.f32 %v1610_v12, 0.0 }
 0x21a   :  { %v1668_v49 = vmax.f32 %v1222_v18, 0.0  ;;  %v1720_v40 = vmax.f32 %v1352_v20, 0.0 }
 0x21b   :  { %v2345_v21 = vadd.f32 %v2344_v30, %v1771_v33  ;;  %v2407_v22 = vadd.f32 %v2406_v53, %v1823_v27 }
 0x21c   :  { %v2222_v32 = vadd.f32 %v2221_v56, %v1668_v49  ;;  %v2284_v63 = vadd.f32 %v2283_v44, %v1720_v40  ;;  %v2260_v40 = vrot.slane %v2259_v39, 1  ;;  %v2383_v56 = vadd.f32 %v2382_v48, %v2381_v52 }
 0x21e   :  { %v1481_v47 = vpop.f32.mrf.mxu2  ;;  %v1611_v24 = vpop.f32.mrf.mxu3  ;;  %v2261_v44 = vadd.f32 %v2260_v40, %v2259_v39  ;;  %v2384_v33 = vrot.slane %v2383_v56, 1 }
 0x21f   :  { %v1224_v7 = vpop.f32.mrf.mxu0  ;;  %v1354_v8 = vpop.f32.mrf.mxu1  ;;  %v1482_v59 = vadd.f32 %v3645_v62, %v1481_v47  ;;  %v1612_v60 = vadd.f32 %v3645_v62, %v1611_v24  ;;  %v2198_v24 = vrot.slane %v2197_v3, 1 }
 0x220   :  { %v1225_v13 = vadd.f32 %v3645_v62, %v1224_v7  ;;  %v1355_v28 = vadd.f32 %v3645_v62, %v1354_v8 }
 0x221   :  { %v1772_v31 = vmax.f32 %v1482_v59, 0.0  ;;  %v1824_v11 = vmax.f32 %v1612_v60, 0.0  ;;  %v2199_v51 = vadd.f32 %v2198_v24, %v2197_v3 }
 0x222   :  { %v1669_v61 = vmax.f32 %v1225_v13, 0.0  ;;  %v1721_v26 = vmax.f32 %v1355_v28, 0.0  ;;  %v2322_v28 = vrot.slane %v2321_v54, 1 }
 0x223   :  { %v2346_v35 = vadd.f32 %v2345_v21, %v1772_v31  ;;  %v2408_v36 = vadd.f32 %v2407_v22, %v1824_v11 }
 0x224   :  { %v2010_v2 = vsel %vm1906_vm2, %v1669_v61, 0.0  ;;  %v2062_v41 = vsel %vm1906_vm2, %v1721_v26, 0.0  ;;  %v2323_v0 = vadd.f32 %v2322_v28, %v2321_v54 }
 0x225   :  { %v2223_v9 = vadd.f32 %v2222_v32, %v2010_v2  ;;  %v2285_v10 = vadd.f32 %v2284_v63, %v2062_v41 }
 0x226   :  { %v1484_v14 = vpop.f32.mrf.mxu2  ;;  %v1614_v15 = vpop.f32.mrf.mxu3 }
 0x227   :  { %v2225_v45 = vrot.slane %v2223_v9, 4  ;;  %v2287_v46 = vrot.slane %v2285_v10, 4  ;;  %v1485_v16 = vadd.f32 %v3645_v62, %v1484_v14  ;;  %v1615_v5 = vadd.f32 %v3645_v62, %v1614_v15  ;;  %v1226_v18 = vpop.f32.mrf.mxu0  ;;  %v1356_v20 = vpop.f32.mrf.mxu1 }
 0x229   :  { %v2226_v34 = vadd.f32 %v2225_v45, %v2223_v9  ;;  %v2288_v6 = vadd.f32 %v2287_v46, %v2285_v10  ;;  %v1773_v17 = vmax.f32 %v1485_v16, 0.0  ;;  %v1825_v23 = vmax.f32 %v1615_v5, 0.0 }
 0x22a   :  { %v2385_v9 = vadd.f32 %v2384_v33, %v2383_v56 }
 0x22b   :  { %v2227_v42 = vrot.slane %v2226_v34, 2  ;;  %v2289_v62 = vrot.slane %v2288_v6, 2  ;;  %v2114_v38 = vsel %vm1906_vm2, %v1773_v17, 0.0  ;;  %v2166_v43 = vsel %vm1906_vm2, %v1825_v23, 0.0 }
 0x22c   :  { %v2347_v58 = vadd.f32 %v2346_v35, %v2114_v38  ;;  %v2409_v47 = vadd.f32 %v2408_v36, %v2166_v43 }
 0x22d   :  { %v2228_v25 = vadd.f32 %v2227_v42, %v2226_v34  ;;  %v2290_v49 = vadd.f32 %v2289_v62, %v2288_v6 }
 0x22e   :  { %v2349_v55 = vrot.slane %v2347_v58, 4  ;;  %v2411_v7 = vrot.slane %v2409_v47, 4  ;;  %v1486_v8 = vpop.f32.mrf.mxu2  ;;  %v1616_v50 = vpop.f32.mrf.mxu3 }
 0x22f   :  { %v2229_v12 = vrot.slane %v2228_v25, 1  ;;  %v2291_v13 = vrot.slane %v2290_v49, 1 }
 0x230   :  { %v2350_v29 = vadd.f32 %v2349_v55, %v2347_v58  ;;  %v2412_v19 = vadd.f32 %v2411_v7, %v2409_v47 }
 0x231   :  { %v2230_v57 = vadd.f32 %v2229_v12, %v2228_v25  ;;  %v2292_v26 = vadd.f32 %v2291_v13, %v2290_v49 }
 0x232   :  { %v2351_v59 = vrot.slane %v2350_v29, 2  ;;  %v2413_v60 = vrot.slane %v2412_v19, 2 }
 0x233   :  { %v2426_v61 = vsel %vm2425_vm3, %v2230_v57, %v2199_v51 }
 0x234   :  { %v2352_v1 = vadd.f32 %v2351_v59, %v2350_v29  ;;  %v2414_v32 = vadd.f32 %v2413_v60, %v2412_v19  ;;  %v2428_v63 = vsel %vm2427_vm4, %v2261_v44, %v2426_v61 }
 0x235   :  { %v2430_v27 = vsel %vm2429_vm5, %v2292_v26, %v2428_v63 }
 0x236   :  { %v2353_v2 = vrot.slane %v2352_v1, 1  ;;  %v2415_v41 = vrot.slane %v2414_v32, 1  ;;  %v2432_v4 = vsel %vm2431_vm6, %v2323_v0, %v2430_v27 }
 0x238   :  { %v2354_v3 = vadd.f32 %v2353_v2, %v2352_v1  ;;  %v2416_v10 = vadd.f32 %v2415_v41, %v2414_v32 }
 0x23a   :  { %v2434_v30 = vsel %vm2433_vm7, %v2354_v3, %v2432_v4 }
 0x23b   :  { %v2436_v53 = vsel %vm2435_vm8, %v2385_v9, %v2434_v30 }
 0x23c   :  { %v2438_v31 = vsel %vm2437_vm9, %v2416_v10, %v2436_v53 }
 0x23d   :  { %v2446_v11 = vmul.f32 0.0051020407, %v2438_v31 }
 0x23f   :  { %2447 = vst [vmem:[#allocation3] sm:$0xff] %v2446_v11 }
 0x240   :  { %2458 = dma.vmem_to_hbm [thread:$0]  %s2454_s4, 128, %s2456_s7, [#allocation4]  }
 0x241   :  { %3134 = dma.done.wait [#allocation4], 128  }
 0x242   :  { %3135 = vsyncadd [#allocation4], 4294967168 }
 0x243   :  { %2463 = vsyncpa [#allocation4], 1 }

</bundles_post_ra>
